<compile_context>
chip_gen: v7x
topology: tpu7x:2x2x1
jax: 0.10.0
libtpu: 0.0.40
codegen_flags: <defaults>
</compile_context>

<pallas_src>
import functools

import jax
import jax.numpy as jnp
from jax.experimental import pallas as pl
from jax.experimental.pallas import tpu as pltpu


# ----------------------------------------------------------------------------
# Fused bidirectional multi-layer LSTM kernel (single program)
# ----------------------------------------------------------------------------
def fused_bilstm_kernel(x_ref, *refs, T, Bc):
    """Whole premise+hypothesis bidirectional LSTM stack in one program.

    x_ref     : (T*Bc, E)  time-major-flattened embeddings (row = t*Bc + b)
    refs[:-1] : per layer  [w_ih (2,in,4H), w_hh (2,H,4H), b (2,1,4H)] ...
    refs[-1]  : out_ref (Bc, 2H) = [h_fwd(T-1) | h_bwd(T-1)] of the last layer
    """
    out_ref = refs[-1]
    layer_refs = refs[:-1]
    num_layers = len(layer_refs) // 3
    H = layer_refs[1].shape[1]            # w_hh_0 : (2, H, 4H)

    def lstm_step(xp_rows, h, c, w_hh_bf):
        # xp_rows: (Bc, 4H) f32 precomputed input projection (+ b_ih + b_hh).
        gates = xp_rows + jnp.dot(h.astype(jnp.bfloat16), w_hh_bf,
                                  preferred_element_type=jnp.float32)
        i = jax.nn.sigmoid(gates[:, 0 * H:1 * H])   # PyTorch gate order
        f = jax.nn.sigmoid(gates[:, 1 * H:2 * H])   # (i, f, g, o)
        g = jnp.tanh(gates[:, 2 * H:3 * H])
        o = jax.nn.sigmoid(gates[:, 3 * H:4 * H])
        c_new = f * c + i * g
        h_new = o * jnp.tanh(c_new)
        return h_new, c_new

    # Current layer input as one or two (T*Bc, k) bf16 matrices.  Keeping the
    # fwd/bwd halves separate (layers >= 1) avoids a lane-concat relayout; the
    # matching W_ih row blocks are sliced instead.
    cur = (x_ref[...].astype(jnp.bfloat16),)
    zeros = jnp.zeros((Bc, H), jnp.float32)

    for layer in range(num_layers):
        w_ih_ref = layer_refs[3 * layer + 0]
        w_hh_ref = layer_refs[3 * layer + 1]
        b_ref = layer_refs[3 * layer + 2]
        last = layer == num_layers - 1

        # ---- hoisted input projection for BOTH directions (one MXU pass) ----
        xps = []
        for d in range(2):
            acc = b_ref[d]                               # (1, 4H), f32
            row = 0
            for piece in cur:
                k = piece.shape[1]
                w_piece = w_ih_ref[d, row:row + k, :].astype(jnp.bfloat16)
                acc = acc + jnp.dot(piece, w_piece,
                                    preferred_element_type=jnp.float32)
                row += k
            xps.append(acc)                              # (T*Bc, 4H) f32

        w_hh_bf = [w_hh_ref[d].astype(jnp.bfloat16) for d in range(2)]

        if not last:
            # Full hidden sequence of both directions; stays on-chip as the
            # next layer's input (no HBM writeback, no XLA concat).
            nxt = []
            for d in range(2):
                h, c = zeros, zeros
                hs = [None] * T
                order = range(T) if d == 0 else range(T - 1, -1, -1)
                for t in order:                          # fully unrolled (T static)
                    h, c = lstm_step(xps[d][t * Bc:(t + 1) * Bc], h, c,
                                     w_hh_bf[d])
                    hs[t] = h                            # natural time order
                nxt.append(jnp.concatenate(hs, axis=0).astype(jnp.bfloat16))
            cur = tuple(nxt)
        else:
            # PyTorch output[:, -1, :]: forward needs its final processed
            # step; the backward hidden at natural time T-1 is its FIRST
            # processed step, i.e. one step from the zero state on x[T-1].
            h, c = zeros, zeros
            for t in range(T):
                h, c = lstm_step(xps[0][t * Bc:(t + 1) * Bc], h, c, w_hh_bf[0])
            h_bwd, _ = lstm_step(xps[1][(T - 1) * Bc:T * Bc], zeros, zeros,
                                 w_hh_bf[1])
            out_ref[...] = jnp.concatenate([h, h_bwd], axis=1)   # (Bc, 2H)


def fused_bilstm(x2d, layers, *, T, Bc, H):
    """x2d: (T*Bc, E) time-major-flattened embeddings.
    layers: list of dicts {'w_ih': (2,in,4H), 'w_hh': (2,H,4H), 'b': (2,1,4H)}.
    Returns (Bc, 2H): last-time-step [fwd | bwd] hidden of the last layer."""
    args = [x2d]
    for lp in layers:
        args += [lp["w_ih"], lp["w_hh"], lp["b"]]

    def full_spec(shape):
        nd = len(shape)
        return pl.BlockSpec(shape, lambda i, nd=nd: (0,) * nd)

    return pl.pallas_call(
        functools.partial(fused_bilstm_kernel, T=T, Bc=Bc),
        out_shape=jax.ShapeDtypeStruct((Bc, 2 * H), jnp.float32),
        grid=(1,),
        in_specs=[full_spec(a.shape) for a in args],
        out_specs=full_spec((Bc, 2 * H)),
        compiler_params=pltpu.CompilerParams(
            dimension_semantics=("arbitrary",)),
    )(*args)


# ----------------------------------------------------------------------------
# Parameters (shapes/init consistent with the PyTorch module)
# ----------------------------------------------------------------------------
def init_params(key, vocab_size, embed_size, hidden_size, num_layers,
                num_classes):
    H = hidden_size
    keys = iter(jax.random.split(key, 4 + num_layers * 4))
    params = {
        "embedding": jax.random.normal(next(keys), (vocab_size, embed_size),
                                       jnp.float32) * 0.1
    }

    bound = 1.0 / (hidden_size ** 0.5)
    layers = []
    for layer in range(num_layers):
        in_size = embed_size if layer == 0 else 2 * H
        w_ih = jax.random.uniform(next(keys), (2, in_size, 4 * H), jnp.float32,
                                  -bound, bound)
        w_hh = jax.random.uniform(next(keys), (2, H, 4 * H), jnp.float32,
                                  -bound, bound)
        b_ih = jax.random.uniform(next(keys), (2, 1, 4 * H), jnp.float32,
                                  -bound, bound)
        b_hh = jax.random.uniform(next(keys), (2, 1, 4 * H), jnp.float32,
                                  -bound, bound)
        layers.append({"w_ih": w_ih, "w_hh": w_hh, "b": b_ih + b_hh})
    params["lstm"] = layers

    fc_in = 4 * H
    fc_bound = 1.0 / (fc_in ** 0.5)
    params["fc_w"] = jax.random.uniform(next(keys), (fc_in, num_classes),
                                        jnp.float32, -fc_bound, fc_bound)
    params["fc_b"] = jax.random.uniform(next(keys), (1, num_classes),
                                        jnp.float32, -fc_bound, fc_bound)
    return params


# ----------------------------------------------------------------------------
# Full forward pass (embedding gather + 1 pallas_call + tiny FC)
# ----------------------------------------------------------------------------
def lstm_model_forward(params, premise_ids, hypothesis_ids):
    B, T = premise_ids.shape
    H = params["lstm"][0]["w_hh"].shape[1]

    # Batch premise + hypothesis: one recurrence pass over Bc = 2B rows.
    ids = jnp.concatenate([premise_ids, hypothesis_ids], axis=0)   # (2B, T)
    Bc = 2 * B

    # Transposing the int ids first makes the XLA gather emit the embeddings
    # directly in time-major order (no activation transpose afterwards).
    x = params["embedding"][ids.T]            # (T, 2B, E)
    # Dropout in inference mode == identity.
    x2d = x.reshape(T * Bc, -1)               # (T*Bc, E), row = t*Bc + b

    h_last = fused_bilstm(x2d, params["lstm"], T=T, Bc=Bc, H=H)    # (2B, 2H)

    prem_last, hyp_last = h_last[:B], h_last[B:]
    combined = jnp.concatenate([prem_last, hyp_last], axis=1)      # (B, 4H)
    # Tiny FC in plain XLA: a pallas_call launch costs more than the math.
    return combined @ params["fc_w"] + params["fc_b"]              # (B, C)


# ----------------------------------------------------------------------------
# Pure-jnp reference (PyTorch semantics) for a loose correctness check
# ----------------------------------------------------------------------------
def reference_forward(params, premise_ids, hypothesis_ids):
    H = params["lstm"][0]["w_hh"].shape[1]

    def encode_last(ids):
        x = params["embedding"][ids]          # (B, T, E) batch-first
        B, T, _ = x.shape
        inp = x
        for lp in params["lstm"]:
            per_dir = []
            for d in range(2):
                w_ih, w_hh, b = lp["w_ih"][d], lp["w_hh"][d], lp["b"][d]
                h = jnp.zeros((B, H), jnp.float32)
                c = jnp.zeros((B, H), jnp.float32)
                seq = [None] * T
                order = range(T) if d == 0 else range(T - 1, -1, -1)
                for t in order:
                    gates = inp[:, t, :] @ w_ih + h @ w_hh + b
                    i = jax.nn.sigmoid(gates[:, 0 * H:1 * H])
                    f = jax.nn.sigmoid(gates[:, 1 * H:2 * H])
                    g = jnp.tanh(gates[:, 2 * H:3 * H])
                    o = jax.nn.sigmoid(gates[:, 3 * H:4 * H])
                    c = f * c + i * g
                    h = o * jnp.tanh(c)
                    seq[t] = h
                per_dir.append(jnp.stack(seq, axis=1))    # (B, T, H)
            inp = jnp.concatenate(per_dir, axis=-1)        # (B, T, 2H)
        return inp[:, -1, :]                                # (B, 2H)

    comb = jnp.concatenate([encode_last(premise_ids),
                            encode_last(hypothesis_ids)], axis=1)
    return comb @ params["fc_w"] + params["fc_b"]


# ----------------------------------------------------------------------------
# Demo
# ----------------------------------------------------------------------------
if __name__ == "__main__":
    VOCAB = 50
    EMBED = 16
    HIDDEN = 32
    NUM_LAYERS = 2
    NUM_CLASSES = 2
    BATCH = 2
    SEQ = 8

    key = jax.random.PRNGKey(0)
    k_param, k_p, k_h = jax.random.split(key, 3)

    params = init_params(k_param, VOCAB, EMBED, HIDDEN, NUM_LAYERS,
                         NUM_CLASSES)
    premise = jax.random.randint(k_p, (BATCH, SEQ), 0, VOCAB, dtype=jnp.int32)
    hypothesis = jax.random.randint(k_h, (BATCH, SEQ), 0, VOCAB,
                                    dtype=jnp.int32)

    fwd = jax.jit(lstm_model_forward)
    logits = fwd(params, premise, hypothesis)
    jax.block_until_ready(logits)

    assert logits.shape == (BATCH, NUM_CLASSES), logits.shape
    assert logits.dtype == jnp.float32
    assert bool(jnp.all(jnp.isfinite(logits)))

    # Loose check vs. a pure-XLA reference (kernel uses bf16 MXU operands).
    ref = jax.jit(reference_forward)(params, premise, hypothesis)
    jax.block_until_ready(ref)
    err = float(jnp.max(jnp.abs(logits - ref)))
    assert err < 5e-2, f"kernel vs reference max abs err {err}"

    print("KERNEL_OK")
</pallas_src>

<mosaic_0001>
module attributes {stable_mosaic.version = 11 : i64} {
  func.func @fused_bilstm_kernel(%arg0: i32, %arg1: memref<32x16xf32, #tpu.memory_space<vmem>>, %arg2: memref<2x16x128xf32, #tpu.memory_space<vmem>>, %arg3: memref<2x32x128xf32, #tpu.memory_space<vmem>>, %arg4: memref<2x1x128xf32, #tpu.memory_space<vmem>>, %arg5: memref<2x64x128xf32, #tpu.memory_space<vmem>>, %arg6: memref<2x32x128xf32, #tpu.memory_space<vmem>>, %arg7: memref<2x1x128xf32, #tpu.memory_space<vmem>>, %arg8: memref<4x64xf32, #tpu.memory_space<vmem>>) attributes {dimension_semantics = [#tpu.dimension_semantics<arbitrary>], iteration_bounds = array<i64: 1>, scalar_prefetch = 0 : i64, scratch_operands = 0 : i64, tpu.core_type = #tpu.core_type<tc>, window_params = [{pipeline_mode = #tpu.pipeline_mode<synchronous>, transform_indices = @transform_0, window_bounds = array<i64: 32, 16>}, {pipeline_mode = #tpu.pipeline_mode<synchronous>, transform_indices = @transform_1, window_bounds = array<i64: 2, 16, 128>}, {pipeline_mode = #tpu.pipeline_mode<synchronous>, transform_indices = @transform_2, window_bounds = array<i64: 2, 32, 128>}, {pipeline_mode = #tpu.pipeline_mode<synchronous>, transform_indices = @transform_3, window_bounds = array<i64: 2, 1, 128>}, {pipeline_mode = #tpu.pipeline_mode<synchronous>, transform_indices = @transform_4, window_bounds = array<i64: 2, 64, 128>}, {pipeline_mode = #tpu.pipeline_mode<synchronous>, transform_indices = @transform_5, window_bounds = array<i64: 2, 32, 128>}, {pipeline_mode = #tpu.pipeline_mode<synchronous>, transform_indices = @transform_6, window_bounds = array<i64: 2, 1, 128>}, {pipeline_mode = #tpu.pipeline_mode<synchronous>, transform_indices = @transform_7, window_bounds = array<i64: 4, 64>}]} {
    %c0 = arith.constant 0 : index
    %c0_0 = arith.constant 0 : index
    %0 = vector.load %arg1[%c0, %c0_0] : memref<32x16xf32, #tpu.memory_space<vmem>>, vector<32x16xf32>
    %1 = arith.truncf %0 : vector<32x16xf32> to vector<32x16xbf16>
    %cst = arith.constant 0.000000e+00 : f32
    %2 = vector.broadcast %cst : f32 to vector<4x32xf32>
    %c0_1 = arith.constant 0 : index
    %c0_2 = arith.constant 0 : index
    %c0_3 = arith.constant 0 : index
    %3 = vector.load %arg4[%c0_1, %c0_2, %c0_3] : memref<2x1x128xf32, #tpu.memory_space<vmem>>, vector<1x1x128xf32>
    %4 = vector.shape_cast %3 : vector<1x1x128xf32> to vector<1x128xf32>
    %c0_4 = arith.constant 0 : index
    %c0_5 = arith.constant 0 : index
    %c0_6 = arith.constant 0 : index
    %5 = vector.load %arg2[%c0_4, %c0_5, %c0_6] : memref<2x16x128xf32, #tpu.memory_space<vmem>>, vector<1x16x128xf32>
    %6 = vector.shape_cast %5 : vector<1x16x128xf32> to vector<16x128xf32>
    %7 = arith.truncf %6 : vector<16x128xf32> to vector<16x128xbf16>
    %cst_7 = arith.constant dense<0.000000e+00> : vector<32x128xf32>
    %8 = tpu.matmul %1, %7, %cst_7 {dimension_numbers = #tpu.dot_dimension_numbers<[1], [0], [0], [1], [0, 0, 1, 1], [], []>} : vector<32x16xbf16>, vector<16x128xbf16>, vector<32x128xf32> -> vector<32x128xf32>
    %9 = vector.broadcast %4 : vector<1x128xf32> to vector<32x128xf32>
    %10 = arith.addf %9, %8 : vector<32x128xf32>
    %c1 = arith.constant 1 : index
    %c0_8 = arith.constant 0 : index
    %c0_9 = arith.constant 0 : index
    %11 = vector.load %arg4[%c1, %c0_8, %c0_9] : memref<2x1x128xf32, #tpu.memory_space<vmem>>, vector<1x1x128xf32>
    %12 = vector.shape_cast %11 : vector<1x1x128xf32> to vector<1x128xf32>
    %c1_10 = arith.constant 1 : index
    %c0_11 = arith.constant 0 : index
    %c0_12 = arith.constant 0 : index
    %13 = vector.load %arg2[%c1_10, %c0_11, %c0_12] : memref<2x16x128xf32, #tpu.memory_space<vmem>>, vector<1x16x128xf32>
    %14 = vector.shape_cast %13 : vector<1x16x128xf32> to vector<16x128xf32>
    %15 = arith.truncf %14 : vector<16x128xf32> to vector<16x128xbf16>
    %cst_13 = arith.constant dense<0.000000e+00> : vector<32x128xf32>
    %16 = tpu.matmul %1, %15, %cst_13 {dimension_numbers = #tpu.dot_dimension_numbers<[1], [0], [0], [1], [0, 0, 1, 1], [], []>} : vector<32x16xbf16>, vector<16x128xbf16>, vector<32x128xf32> -> vector<32x128xf32>
    %17 = vector.broadcast %12 : vector<1x128xf32> to vector<32x128xf32>
    %18 = arith.addf %17, %16 : vector<32x128xf32>
    %c0_14 = arith.constant 0 : index
    %c0_15 = arith.constant 0 : index
    %c0_16 = arith.constant 0 : index
    %19 = vector.load %arg3[%c0_14, %c0_15, %c0_16] : memref<2x32x128xf32, #tpu.memory_space<vmem>>, vector<1x32x128xf32>
    %20 = vector.shape_cast %19 : vector<1x32x128xf32> to vector<32x128xf32>
    %21 = arith.truncf %20 : vector<32x128xf32> to vector<32x128xbf16>
    %c1_17 = arith.constant 1 : index
    %c0_18 = arith.constant 0 : index
    %c0_19 = arith.constant 0 : index
    %22 = vector.load %arg3[%c1_17, %c0_18, %c0_19] : memref<2x32x128xf32, #tpu.memory_space<vmem>>, vector<1x32x128xf32>
    %23 = vector.shape_cast %22 : vector<1x32x128xf32> to vector<32x128xf32>
    %24 = arith.truncf %23 : vector<32x128xf32> to vector<32x128xbf16>
    %25 = vector.extract_strided_slice %10 {offsets = [0, 0], sizes = [4, 128], strides = [1, 1]} : vector<32x128xf32> to vector<4x128xf32>
    %26 = arith.truncf %2 : vector<4x32xf32> to vector<4x32xbf16>
    %cst_20 = arith.constant dense<0.000000e+00> : vector<4x128xf32>
    %27 = tpu.matmul %26, %21, %cst_20 {dimension_numbers = #tpu.dot_dimension_numbers<[1], [0], [0], [1], [0, 0, 1, 1], [], []>} : vector<4x32xbf16>, vector<32x128xbf16>, vector<4x128xf32> -> vector<4x128xf32>
    %28 = arith.addf %25, %27 : vector<4x128xf32>
    %29 = vector.extract_strided_slice %28 {offsets = [0, 0], sizes = [4, 32], strides = [1, 1]} : vector<4x128xf32> to vector<4x32xf32>
    %30 = arith.negf %29 : vector<4x32xf32>
    %31 = math.exp %30 : vector<4x32xf32>
    %cst_21 = arith.constant 1.000000e+00 : f32
    %32 = vector.broadcast %cst_21 : f32 to vector<4x32xf32>
    %33 = arith.addf %32, %31 : vector<4x32xf32>
    %34 = arith.divf %32, %33 : vector<4x32xf32>
    %35 = vector.extract_strided_slice %28 {offsets = [0, 32], sizes = [4, 32], strides = [1, 1]} : vector<4x128xf32> to vector<4x32xf32>
    %36 = arith.negf %35 : vector<4x32xf32>
    %37 = math.exp %36 : vector<4x32xf32>
    %cst_22 = arith.constant 1.000000e+00 : f32
    %38 = vector.broadcast %cst_22 : f32 to vector<4x32xf32>
    %39 = arith.addf %38, %37 : vector<4x32xf32>
    %40 = arith.divf %38, %39 : vector<4x32xf32>
    %41 = vector.extract_strided_slice %28 {offsets = [0, 64], sizes = [4, 32], strides = [1, 1]} : vector<4x128xf32> to vector<4x32xf32>
    %42 = math.tanh %41 : vector<4x32xf32>
    %43 = vector.extract_strided_slice %28 {offsets = [0, 96], sizes = [4, 32], strides = [1, 1]} : vector<4x128xf32> to vector<4x32xf32>
    %44 = arith.negf %43 : vector<4x32xf32>
    %45 = math.exp %44 : vector<4x32xf32>
    %cst_23 = arith.constant 1.000000e+00 : f32
    %46 = vector.broadcast %cst_23 : f32 to vector<4x32xf32>
    %47 = arith.addf %46, %45 : vector<4x32xf32>
    %48 = arith.divf %46, %47 : vector<4x32xf32>
    %49 = arith.mulf %40, %2 : vector<4x32xf32>
    %50 = arith.mulf %34, %42 : vector<4x32xf32>
    %51 = arith.addf %49, %50 : vector<4x32xf32>
    %52 = math.tanh %51 : vector<4x32xf32>
    %53 = arith.mulf %48, %52 : vector<4x32xf32>
    %54 = vector.extract_strided_slice %10 {offsets = [4, 0], sizes = [4, 128], strides = [1, 1]} : vector<32x128xf32> to vector<4x128xf32>
    %55 = arith.truncf %53 : vector<4x32xf32> to vector<4x32xbf16>
    %cst_24 = arith.constant dense<0.000000e+00> : vector<4x128xf32>
    %56 = tpu.matmul %55, %21, %cst_24 {dimension_numbers = #tpu.dot_dimension_numbers<[1], [0], [0], [1], [0, 0, 1, 1], [], []>} : vector<4x32xbf16>, vector<32x128xbf16>, vector<4x128xf32> -> vector<4x128xf32>
    %57 = arith.addf %54, %56 : vector<4x128xf32>
    %58 = vector.extract_strided_slice %57 {offsets = [0, 0], sizes = [4, 32], strides = [1, 1]} : vector<4x128xf32> to vector<4x32xf32>
    %59 = arith.negf %58 : vector<4x32xf32>
    %60 = math.exp %59 : vector<4x32xf32>
    %cst_25 = arith.constant 1.000000e+00 : f32
    %61 = vector.broadcast %cst_25 : f32 to vector<4x32xf32>
    %62 = arith.addf %61, %60 : vector<4x32xf32>
    %63 = arith.divf %61, %62 : vector<4x32xf32>
    %64 = vector.extract_strided_slice %57 {offsets = [0, 32], sizes = [4, 32], strides = [1, 1]} : vector<4x128xf32> to vector<4x32xf32>
    %65 = arith.negf %64 : vector<4x32xf32>
    %66 = math.exp %65 : vector<4x32xf32>
    %cst_26 = arith.constant 1.000000e+00 : f32
    %67 = vector.broadcast %cst_26 : f32 to vector<4x32xf32>
    %68 = arith.addf %67, %66 : vector<4x32xf32>
    %69 = arith.divf %67, %68 : vector<4x32xf32>
    %70 = vector.extract_strided_slice %57 {offsets = [0, 64], sizes = [4, 32], strides = [1, 1]} : vector<4x128xf32> to vector<4x32xf32>
    %71 = math.tanh %70 : vector<4x32xf32>
    %72 = vector.extract_strided_slice %57 {offsets = [0, 96], sizes = [4, 32], strides = [1, 1]} : vector<4x128xf32> to vector<4x32xf32>
    %73 = arith.negf %72 : vector<4x32xf32>
    %74 = math.exp %73 : vector<4x32xf32>
    %cst_27 = arith.constant 1.000000e+00 : f32
    %75 = vector.broadcast %cst_27 : f32 to vector<4x32xf32>
    %76 = arith.addf %75, %74 : vector<4x32xf32>
    %77 = arith.divf %75, %76 : vector<4x32xf32>
    %78 = arith.mulf %69, %51 : vector<4x32xf32>
    %79 = arith.mulf %63, %71 : vector<4x32xf32>
    %80 = arith.addf %78, %79 : vector<4x32xf32>
    %81 = math.tanh %80 : vector<4x32xf32>
    %82 = arith.mulf %77, %81 : vector<4x32xf32>
    %83 = vector.extract_strided_slice %10 {offsets = [8, 0], sizes = [4, 128], strides = [1, 1]} : vector<32x128xf32> to vector<4x128xf32>
    %84 = arith.truncf %82 : vector<4x32xf32> to vector<4x32xbf16>
    %cst_28 = arith.constant dense<0.000000e+00> : vector<4x128xf32>
    %85 = tpu.matmul %84, %21, %cst_28 {dimension_numbers = #tpu.dot_dimension_numbers<[1], [0], [0], [1], [0, 0, 1, 1], [], []>} : vector<4x32xbf16>, vector<32x128xbf16>, vector<4x128xf32> -> vector<4x128xf32>
    %86 = arith.addf %83, %85 : vector<4x128xf32>
    %87 = vector.extract_strided_slice %86 {offsets = [0, 0], sizes = [4, 32], strides = [1, 1]} : vector<4x128xf32> to vector<4x32xf32>
    %88 = arith.negf %87 : vector<4x32xf32>
    %89 = math.exp %88 : vector<4x32xf32>
    %cst_29 = arith.constant 1.000000e+00 : f32
    %90 = vector.broadcast %cst_29 : f32 to vector<4x32xf32>
    %91 = arith.addf %90, %89 : vector<4x32xf32>
    %92 = arith.divf %90, %91 : vector<4x32xf32>
    %93 = vector.extract_strided_slice %86 {offsets = [0, 32], sizes = [4, 32], strides = [1, 1]} : vector<4x128xf32> to vector<4x32xf32>
    %94 = arith.negf %93 : vector<4x32xf32>
    %95 = math.exp %94 : vector<4x32xf32>
    %cst_30 = arith.constant 1.000000e+00 : f32
    %96 = vector.broadcast %cst_30 : f32 to vector<4x32xf32>
    %97 = arith.addf %96, %95 : vector<4x32xf32>
    %98 = arith.divf %96, %97 : vector<4x32xf32>
    %99 = vector.extract_strided_slice %86 {offsets = [0, 64], sizes = [4, 32], strides = [1, 1]} : vector<4x128xf32> to vector<4x32xf32>
    %100 = math.tanh %99 : vector<4x32xf32>
    %101 = vector.extract_strided_slice %86 {offsets = [0, 96], sizes = [4, 32], strides = [1, 1]} : vector<4x128xf32> to vector<4x32xf32>
    %102 = arith.negf %101 : vector<4x32xf32>
    %103 = math.exp %102 : vector<4x32xf32>
    %cst_31 = arith.constant 1.000000e+00 : f32
    %104 = vector.broadcast %cst_31 : f32 to vector<4x32xf32>
    %105 = arith.addf %104, %103 : vector<4x32xf32>
    %106 = arith.divf %104, %105 : vector<4x32xf32>
    %107 = arith.mulf %98, %80 : vector<4x32xf32>
    %108 = arith.mulf %92, %100 : vector<4x32xf32>
    %109 = arith.addf %107, %108 : vector<4x32xf32>
    %110 = math.tanh %109 : vector<4x32xf32>
    %111 = arith.mulf %106, %110 : vector<4x32xf32>
    %112 = vector.extract_strided_slice %10 {offsets = [12, 0], sizes = [4, 128], strides = [1, 1]} : vector<32x128xf32> to vector<4x128xf32>
    %113 = arith.truncf %111 : vector<4x32xf32> to vector<4x32xbf16>
    %cst_32 = arith.constant dense<0.000000e+00> : vector<4x128xf32>
    %114 = tpu.matmul %113, %21, %cst_32 {dimension_numbers = #tpu.dot_dimension_numbers<[1], [0], [0], [1], [0, 0, 1, 1], [], []>} : vector<4x32xbf16>, vector<32x128xbf16>, vector<4x128xf32> -> vector<4x128xf32>
    %115 = arith.addf %112, %114 : vector<4x128xf32>
    %116 = vector.extract_strided_slice %115 {offsets = [0, 0], sizes = [4, 32], strides = [1, 1]} : vector<4x128xf32> to vector<4x32xf32>
    %117 = arith.negf %116 : vector<4x32xf32>
    %118 = math.exp %117 : vector<4x32xf32>
    %cst_33 = arith.constant 1.000000e+00 : f32
    %119 = vector.broadcast %cst_33 : f32 to vector<4x32xf32>
    %120 = arith.addf %119, %118 : vector<4x32xf32>
    %121 = arith.divf %119, %120 : vector<4x32xf32>
    %122 = vector.extract_strided_slice %115 {offsets = [0, 32], sizes = [4, 32], strides = [1, 1]} : vector<4x128xf32> to vector<4x32xf32>
    %123 = arith.negf %122 : vector<4x32xf32>
    %124 = math.exp %123 : vector<4x32xf32>
    %cst_34 = arith.constant 1.000000e+00 : f32
    %125 = vector.broadcast %cst_34 : f32 to vector<4x32xf32>
    %126 = arith.addf %125, %124 : vector<4x32xf32>
    %127 = arith.divf %125, %126 : vector<4x32xf32>
    %128 = vector.extract_strided_slice %115 {offsets = [0, 64], sizes = [4, 32], strides = [1, 1]} : vector<4x128xf32> to vector<4x32xf32>
    %129 = math.tanh %128 : vector<4x32xf32>
    %130 = vector.extract_strided_slice %115 {offsets = [0, 96], sizes = [4, 32], strides = [1, 1]} : vector<4x128xf32> to vector<4x32xf32>
    %131 = arith.negf %130 : vector<4x32xf32>
    %132 = math.exp %131 : vector<4x32xf32>
    %cst_35 = arith.constant 1.000000e+00 : f32
    %133 = vector.broadcast %cst_35 : f32 to vector<4x32xf32>
    %134 = arith.addf %133, %132 : vector<4x32xf32>
    %135 = arith.divf %133, %134 : vector<4x32xf32>
    %136 = arith.mulf %127, %109 : vector<4x32xf32>
    %137 = arith.mulf %121, %129 : vector<4x32xf32>
    %138 = arith.addf %136, %137 : vector<4x32xf32>
    %139 = math.tanh %138 : vector<4x32xf32>
    %140 = arith.mulf %135, %139 : vector<4x32xf32>
    %141 = vector.extract_strided_slice %10 {offsets = [16, 0], sizes = [4, 128], strides = [1, 1]} : vector<32x128xf32> to vector<4x128xf32>
    %142 = arith.truncf %140 : vector<4x32xf32> to vector<4x32xbf16>
    %cst_36 = arith.constant dense<0.000000e+00> : vector<4x128xf32>
    %143 = tpu.matmul %142, %21, %cst_36 {dimension_numbers = #tpu.dot_dimension_numbers<[1], [0], [0], [1], [0, 0, 1, 1], [], []>} : vector<4x32xbf16>, vector<32x128xbf16>, vector<4x128xf32> -> vector<4x128xf32>
    %144 = arith.addf %141, %143 : vector<4x128xf32>
    %145 = vector.extract_strided_slice %144 {offsets = [0, 0], sizes = [4, 32], strides = [1, 1]} : vector<4x128xf32> to vector<4x32xf32>
    %146 = arith.negf %145 : vector<4x32xf32>
    %147 = math.exp %146 : vector<4x32xf32>
    %cst_37 = arith.constant 1.000000e+00 : f32
    %148 = vector.broadcast %cst_37 : f32 to vector<4x32xf32>
    %149 = arith.addf %148, %147 : vector<4x32xf32>
    %150 = arith.divf %148, %149 : vector<4x32xf32>
    %151 = vector.extract_strided_slice %144 {offsets = [0, 32], sizes = [4, 32], strides = [1, 1]} : vector<4x128xf32> to vector<4x32xf32>
    %152 = arith.negf %151 : vector<4x32xf32>
    %153 = math.exp %152 : vector<4x32xf32>
    %cst_38 = arith.constant 1.000000e+00 : f32
    %154 = vector.broadcast %cst_38 : f32 to vector<4x32xf32>
    %155 = arith.addf %154, %153 : vector<4x32xf32>
    %156 = arith.divf %154, %155 : vector<4x32xf32>
    %157 = vector.extract_strided_slice %144 {offsets = [0, 64], sizes = [4, 32], strides = [1, 1]} : vector<4x128xf32> to vector<4x32xf32>
    %158 = math.tanh %157 : vector<4x32xf32>
    %159 = vector.extract_strided_slice %144 {offsets = [0, 96], sizes = [4, 32], strides = [1, 1]} : vector<4x128xf32> to vector<4x32xf32>
    %160 = arith.negf %159 : vector<4x32xf32>
    %161 = math.exp %160 : vector<4x32xf32>
    %cst_39 = arith.constant 1.000000e+00 : f32
    %162 = vector.broadcast %cst_39 : f32 to vector<4x32xf32>
    %163 = arith.addf %162, %161 : vector<4x32xf32>
    %164 = arith.divf %162, %163 : vector<4x32xf32>
    %165 = arith.mulf %156, %138 : vector<4x32xf32>
    %166 = arith.mulf %150, %158 : vector<4x32xf32>
    %167 = arith.addf %165, %166 : vector<4x32xf32>
    %168 = math.tanh %167 : vector<4x32xf32>
    %169 = arith.mulf %164, %168 : vector<4x32xf32>
    %170 = vector.extract_strided_slice %10 {offsets = [20, 0], sizes = [4, 128], strides = [1, 1]} : vector<32x128xf32> to vector<4x128xf32>
    %171 = arith.truncf %169 : vector<4x32xf32> to vector<4x32xbf16>
    %cst_40 = arith.constant dense<0.000000e+00> : vector<4x128xf32>
    %172 = tpu.matmul %171, %21, %cst_40 {dimension_numbers = #tpu.dot_dimension_numbers<[1], [0], [0], [1], [0, 0, 1, 1], [], []>} : vector<4x32xbf16>, vector<32x128xbf16>, vector<4x128xf32> -> vector<4x128xf32>
    %173 = arith.addf %170, %172 : vector<4x128xf32>
    %174 = vector.extract_strided_slice %173 {offsets = [0, 0], sizes = [4, 32], strides = [1, 1]} : vector<4x128xf32> to vector<4x32xf32>
    %175 = arith.negf %174 : vector<4x32xf32>
    %176 = math.exp %175 : vector<4x32xf32>
    %cst_41 = arith.constant 1.000000e+00 : f32
    %177 = vector.broadcast %cst_41 : f32 to vector<4x32xf32>
    %178 = arith.addf %177, %176 : vector<4x32xf32>
    %179 = arith.divf %177, %178 : vector<4x32xf32>
    %180 = vector.extract_strided_slice %173 {offsets = [0, 32], sizes = [4, 32], strides = [1, 1]} : vector<4x128xf32> to vector<4x32xf32>
    %181 = arith.negf %180 : vector<4x32xf32>
    %182 = math.exp %181 : vector<4x32xf32>
    %cst_42 = arith.constant 1.000000e+00 : f32
    %183 = vector.broadcast %cst_42 : f32 to vector<4x32xf32>
    %184 = arith.addf %183, %182 : vector<4x32xf32>
    %185 = arith.divf %183, %184 : vector<4x32xf32>
    %186 = vector.extract_strided_slice %173 {offsets = [0, 64], sizes = [4, 32], strides = [1, 1]} : vector<4x128xf32> to vector<4x32xf32>
    %187 = math.tanh %186 : vector<4x32xf32>
    %188 = vector.extract_strided_slice %173 {offsets = [0, 96], sizes = [4, 32], strides = [1, 1]} : vector<4x128xf32> to vector<4x32xf32>
    %189 = arith.negf %188 : vector<4x32xf32>
    %190 = math.exp %189 : vector<4x32xf32>
    %cst_43 = arith.constant 1.000000e+00 : f32
    %191 = vector.broadcast %cst_43 : f32 to vector<4x32xf32>
    %192 = arith.addf %191, %190 : vector<4x32xf32>
    %193 = arith.divf %191, %192 : vector<4x32xf32>
    %194 = arith.mulf %185, %167 : vector<4x32xf32>
    %195 = arith.mulf %179, %187 : vector<4x32xf32>
    %196 = arith.addf %194, %195 : vector<4x32xf32>
    %197 = math.tanh %196 : vector<4x32xf32>
    %198 = arith.mulf %193, %197 : vector<4x32xf32>
    %199 = vector.extract_strided_slice %10 {offsets = [24, 0], sizes = [4, 128], strides = [1, 1]} : vector<32x128xf32> to vector<4x128xf32>
    %200 = arith.truncf %198 : vector<4x32xf32> to vector<4x32xbf16>
    %cst_44 = arith.constant dense<0.000000e+00> : vector<4x128xf32>
    %201 = tpu.matmul %200, %21, %cst_44 {dimension_numbers = #tpu.dot_dimension_numbers<[1], [0], [0], [1], [0, 0, 1, 1], [], []>} : vector<4x32xbf16>, vector<32x128xbf16>, vector<4x128xf32> -> vector<4x128xf32>
    %202 = arith.addf %199, %201 : vector<4x128xf32>
    %203 = vector.extract_strided_slice %202 {offsets = [0, 0], sizes = [4, 32], strides = [1, 1]} : vector<4x128xf32> to vector<4x32xf32>
    %204 = arith.negf %203 : vector<4x32xf32>
    %205 = math.exp %204 : vector<4x32xf32>
    %cst_45 = arith.constant 1.000000e+00 : f32
    %206 = vector.broadcast %cst_45 : f32 to vector<4x32xf32>
    %207 = arith.addf %206, %205 : vector<4x32xf32>
    %208 = arith.divf %206, %207 : vector<4x32xf32>
    %209 = vector.extract_strided_slice %202 {offsets = [0, 32], sizes = [4, 32], strides = [1, 1]} : vector<4x128xf32> to vector<4x32xf32>
    %210 = arith.negf %209 : vector<4x32xf32>
    %211 = math.exp %210 : vector<4x32xf32>
    %cst_46 = arith.constant 1.000000e+00 : f32
    %212 = vector.broadcast %cst_46 : f32 to vector<4x32xf32>
    %213 = arith.addf %212, %211 : vector<4x32xf32>
    %214 = arith.divf %212, %213 : vector<4x32xf32>
    %215 = vector.extract_strided_slice %202 {offsets = [0, 64], sizes = [4, 32], strides = [1, 1]} : vector<4x128xf32> to vector<4x32xf32>
    %216 = math.tanh %215 : vector<4x32xf32>
    %217 = vector.extract_strided_slice %202 {offsets = [0, 96], sizes = [4, 32], strides = [1, 1]} : vector<4x128xf32> to vector<4x32xf32>
    %218 = arith.negf %217 : vector<4x32xf32>
    %219 = math.exp %218 : vector<4x32xf32>
    %cst_47 = arith.constant 1.000000e+00 : f32
    %220 = vector.broadcast %cst_47 : f32 to vector<4x32xf32>
    %221 = arith.addf %220, %219 : vector<4x32xf32>
    %222 = arith.divf %220, %221 : vector<4x32xf32>
    %223 = arith.mulf %214, %196 : vector<4x32xf32>
    %224 = arith.mulf %208, %216 : vector<4x32xf32>
    %225 = arith.addf %223, %224 : vector<4x32xf32>
    %226 = math.tanh %225 : vector<4x32xf32>
    %227 = arith.mulf %222, %226 : vector<4x32xf32>
    %228 = vector.extract_strided_slice %10 {offsets = [28, 0], sizes = [4, 128], strides = [1, 1]} : vector<32x128xf32> to vector<4x128xf32>
    %229 = arith.truncf %227 : vector<4x32xf32> to vector<4x32xbf16>
    %cst_48 = arith.constant dense<0.000000e+00> : vector<4x128xf32>
    %230 = tpu.matmul %229, %21, %cst_48 {dimension_numbers = #tpu.dot_dimension_numbers<[1], [0], [0], [1], [0, 0, 1, 1], [], []>} : vector<4x32xbf16>, vector<32x128xbf16>, vector<4x128xf32> -> vector<4x128xf32>
    %231 = arith.addf %228, %230 : vector<4x128xf32>
    %232 = vector.extract_strided_slice %231 {offsets = [0, 0], sizes = [4, 32], strides = [1, 1]} : vector<4x128xf32> to vector<4x32xf32>
    %233 = arith.negf %232 : vector<4x32xf32>
    %234 = math.exp %233 : vector<4x32xf32>
    %cst_49 = arith.constant 1.000000e+00 : f32
    %235 = vector.broadcast %cst_49 : f32 to vector<4x32xf32>
    %236 = arith.addf %235, %234 : vector<4x32xf32>
    %237 = arith.divf %235, %236 : vector<4x32xf32>
    %238 = vector.extract_strided_slice %231 {offsets = [0, 32], sizes = [4, 32], strides = [1, 1]} : vector<4x128xf32> to vector<4x32xf32>
    %239 = arith.negf %238 : vector<4x32xf32>
    %240 = math.exp %239 : vector<4x32xf32>
    %cst_50 = arith.constant 1.000000e+00 : f32
    %241 = vector.broadcast %cst_50 : f32 to vector<4x32xf32>
    %242 = arith.addf %241, %240 : vector<4x32xf32>
    %243 = arith.divf %241, %242 : vector<4x32xf32>
    %244 = vector.extract_strided_slice %231 {offsets = [0, 64], sizes = [4, 32], strides = [1, 1]} : vector<4x128xf32> to vector<4x32xf32>
    %245 = math.tanh %244 : vector<4x32xf32>
    %246 = vector.extract_strided_slice %231 {offsets = [0, 96], sizes = [4, 32], strides = [1, 1]} : vector<4x128xf32> to vector<4x32xf32>
    %247 = arith.negf %246 : vector<4x32xf32>
    %248 = math.exp %247 : vector<4x32xf32>
    %cst_51 = arith.constant 1.000000e+00 : f32
    %249 = vector.broadcast %cst_51 : f32 to vector<4x32xf32>
    %250 = arith.addf %249, %248 : vector<4x32xf32>
    %251 = arith.divf %249, %250 : vector<4x32xf32>
    %252 = arith.mulf %243, %225 : vector<4x32xf32>
    %253 = arith.mulf %237, %245 : vector<4x32xf32>
    %254 = arith.addf %252, %253 : vector<4x32xf32>
    %255 = math.tanh %254 : vector<4x32xf32>
    %256 = arith.mulf %251, %255 : vector<4x32xf32>
    %257 = tpu.concatenate %53, %82, %111, %140, %169, %198, %227, %256 in 0 : vector<4x32xf32>, vector<4x32xf32>, vector<4x32xf32>, vector<4x32xf32>, vector<4x32xf32>, vector<4x32xf32>, vector<4x32xf32>, vector<4x32xf32> -> vector<32x32xf32>
    %258 = arith.truncf %257 : vector<32x32xf32> to vector<32x32xbf16>
    %259 = vector.extract_strided_slice %18 {offsets = [28, 0], sizes = [4, 128], strides = [1, 1]} : vector<32x128xf32> to vector<4x128xf32>
    %260 = arith.truncf %2 : vector<4x32xf32> to vector<4x32xbf16>
    %cst_52 = arith.constant dense<0.000000e+00> : vector<4x128xf32>
    %261 = tpu.matmul %260, %24, %cst_52 {dimension_numbers = #tpu.dot_dimension_numbers<[1], [0], [0], [1], [0, 0, 1, 1], [], []>} : vector<4x32xbf16>, vector<32x128xbf16>, vector<4x128xf32> -> vector<4x128xf32>
    %262 = arith.addf %259, %261 : vector<4x128xf32>
    %263 = vector.extract_strided_slice %262 {offsets = [0, 0], sizes = [4, 32], strides = [1, 1]} : vector<4x128xf32> to vector<4x32xf32>
    %264 = arith.negf %263 : vector<4x32xf32>
    %265 = math.exp %264 : vector<4x32xf32>
    %cst_53 = arith.constant 1.000000e+00 : f32
    %266 = vector.broadcast %cst_53 : f32 to vector<4x32xf32>
    %267 = arith.addf %266, %265 : vector<4x32xf32>
    %268 = arith.divf %266, %267 : vector<4x32xf32>
    %269 = vector.extract_strided_slice %262 {offsets = [0, 32], sizes = [4, 32], strides = [1, 1]} : vector<4x128xf32> to vector<4x32xf32>
    %270 = arith.negf %269 : vector<4x32xf32>
    %271 = math.exp %270 : vector<4x32xf32>
    %cst_54 = arith.constant 1.000000e+00 : f32
    %272 = vector.broadcast %cst_54 : f32 to vector<4x32xf32>
    %273 = arith.addf %272, %271 : vector<4x32xf32>
    %274 = arith.divf %272, %273 : vector<4x32xf32>
    %275 = vector.extract_strided_slice %262 {offsets = [0, 64], sizes = [4, 32], strides = [1, 1]} : vector<4x128xf32> to vector<4x32xf32>
    %276 = math.tanh %275 : vector<4x32xf32>
    %277 = vector.extract_strided_slice %262 {offsets = [0, 96], sizes = [4, 32], strides = [1, 1]} : vector<4x128xf32> to vector<4x32xf32>
    %278 = arith.negf %277 : vector<4x32xf32>
    %279 = math.exp %278 : vector<4x32xf32>
    %cst_55 = arith.constant 1.000000e+00 : f32
    %280 = vector.broadcast %cst_55 : f32 to vector<4x32xf32>
    %281 = arith.addf %280, %279 : vector<4x32xf32>
    %282 = arith.divf %280, %281 : vector<4x32xf32>
    %283 = arith.mulf %274, %2 : vector<4x32xf32>
    %284 = arith.mulf %268, %276 : vector<4x32xf32>
    %285 = arith.addf %283, %284 : vector<4x32xf32>
    %286 = math.tanh %285 : vector<4x32xf32>
    %287 = arith.mulf %282, %286 : vector<4x32xf32>
    %288 = vector.extract_strided_slice %18 {offsets = [24, 0], sizes = [4, 128], strides = [1, 1]} : vector<32x128xf32> to vector<4x128xf32>
    %289 = arith.truncf %287 : vector<4x32xf32> to vector<4x32xbf16>
    %cst_56 = arith.constant dense<0.000000e+00> : vector<4x128xf32>
    %290 = tpu.matmul %289, %24, %cst_56 {dimension_numbers = #tpu.dot_dimension_numbers<[1], [0], [0], [1], [0, 0, 1, 1], [], []>} : vector<4x32xbf16>, vector<32x128xbf16>, vector<4x128xf32> -> vector<4x128xf32>
    %291 = arith.addf %288, %290 : vector<4x128xf32>
    %292 = vector.extract_strided_slice %291 {offsets = [0, 0], sizes = [4, 32], strides = [1, 1]} : vector<4x128xf32> to vector<4x32xf32>
    %293 = arith.negf %292 : vector<4x32xf32>
    %294 = math.exp %293 : vector<4x32xf32>
    %cst_57 = arith.constant 1.000000e+00 : f32
    %295 = vector.broadcast %cst_57 : f32 to vector<4x32xf32>
    %296 = arith.addf %295, %294 : vector<4x32xf32>
    %297 = arith.divf %295, %296 : vector<4x32xf32>
    %298 = vector.extract_strided_slice %291 {offsets = [0, 32], sizes = [4, 32], strides = [1, 1]} : vector<4x128xf32> to vector<4x32xf32>
    %299 = arith.negf %298 : vector<4x32xf32>
    %300 = math.exp %299 : vector<4x32xf32>
    %cst_58 = arith.constant 1.000000e+00 : f32
    %301 = vector.broadcast %cst_58 : f32 to vector<4x32xf32>
    %302 = arith.addf %301, %300 : vector<4x32xf32>
    %303 = arith.divf %301, %302 : vector<4x32xf32>
    %304 = vector.extract_strided_slice %291 {offsets = [0, 64], sizes = [4, 32], strides = [1, 1]} : vector<4x128xf32> to vector<4x32xf32>
    %305 = math.tanh %304 : vector<4x32xf32>
    %306 = vector.extract_strided_slice %291 {offsets = [0, 96], sizes = [4, 32], strides = [1, 1]} : vector<4x128xf32> to vector<4x32xf32>
    %307 = arith.negf %306 : vector<4x32xf32>
    %308 = math.exp %307 : vector<4x32xf32>
    %cst_59 = arith.constant 1.000000e+00 : f32
    %309 = vector.broadcast %cst_59 : f32 to vector<4x32xf32>
    %310 = arith.addf %309, %308 : vector<4x32xf32>
    %311 = arith.divf %309, %310 : vector<4x32xf32>
    %312 = arith.mulf %303, %285 : vector<4x32xf32>
    %313 = arith.mulf %297, %305 : vector<4x32xf32>
    %314 = arith.addf %312, %313 : vector<4x32xf32>
    %315 = math.tanh %314 : vector<4x32xf32>
    %316 = arith.mulf %311, %315 : vector<4x32xf32>
    %317 = vector.extract_strided_slice %18 {offsets = [20, 0], sizes = [4, 128], strides = [1, 1]} : vector<32x128xf32> to vector<4x128xf32>
    %318 = arith.truncf %316 : vector<4x32xf32> to vector<4x32xbf16>
    %cst_60 = arith.constant dense<0.000000e+00> : vector<4x128xf32>
    %319 = tpu.matmul %318, %24, %cst_60 {dimension_numbers = #tpu.dot_dimension_numbers<[1], [0], [0], [1], [0, 0, 1, 1], [], []>} : vector<4x32xbf16>, vector<32x128xbf16>, vector<4x128xf32> -> vector<4x128xf32>
    %320 = arith.addf %317, %319 : vector<4x128xf32>
    %321 = vector.extract_strided_slice %320 {offsets = [0, 0], sizes = [4, 32], strides = [1, 1]} : vector<4x128xf32> to vector<4x32xf32>
    %322 = arith.negf %321 : vector<4x32xf32>
    %323 = math.exp %322 : vector<4x32xf32>
    %cst_61 = arith.constant 1.000000e+00 : f32
    %324 = vector.broadcast %cst_61 : f32 to vector<4x32xf32>
    %325 = arith.addf %324, %323 : vector<4x32xf32>
    %326 = arith.divf %324, %325 : vector<4x32xf32>
    %327 = vector.extract_strided_slice %320 {offsets = [0, 32], sizes = [4, 32], strides = [1, 1]} : vector<4x128xf32> to vector<4x32xf32>
    %328 = arith.negf %327 : vector<4x32xf32>
    %329 = math.exp %328 : vector<4x32xf32>
    %cst_62 = arith.constant 1.000000e+00 : f32
    %330 = vector.broadcast %cst_62 : f32 to vector<4x32xf32>
    %331 = arith.addf %330, %329 : vector<4x32xf32>
    %332 = arith.divf %330, %331 : vector<4x32xf32>
    %333 = vector.extract_strided_slice %320 {offsets = [0, 64], sizes = [4, 32], strides = [1, 1]} : vector<4x128xf32> to vector<4x32xf32>
    %334 = math.tanh %333 : vector<4x32xf32>
    %335 = vector.extract_strided_slice %320 {offsets = [0, 96], sizes = [4, 32], strides = [1, 1]} : vector<4x128xf32> to vector<4x32xf32>
    %336 = arith.negf %335 : vector<4x32xf32>
    %337 = math.exp %336 : vector<4x32xf32>
    %cst_63 = arith.constant 1.000000e+00 : f32
    %338 = vector.broadcast %cst_63 : f32 to vector<4x32xf32>
    %339 = arith.addf %338, %337 : vector<4x32xf32>
    %340 = arith.divf %338, %339 : vector<4x32xf32>
    %341 = arith.mulf %332, %314 : vector<4x32xf32>
    %342 = arith.mulf %326, %334 : vector<4x32xf32>
    %343 = arith.addf %341, %342 : vector<4x32xf32>
    %344 = math.tanh %343 : vector<4x32xf32>
    %345 = arith.mulf %340, %344 : vector<4x32xf32>
    %346 = vector.extract_strided_slice %18 {offsets = [16, 0], sizes = [4, 128], strides = [1, 1]} : vector<32x128xf32> to vector<4x128xf32>
    %347 = arith.truncf %345 : vector<4x32xf32> to vector<4x32xbf16>
    %cst_64 = arith.constant dense<0.000000e+00> : vector<4x128xf32>
    %348 = tpu.matmul %347, %24, %cst_64 {dimension_numbers = #tpu.dot_dimension_numbers<[1], [0], [0], [1], [0, 0, 1, 1], [], []>} : vector<4x32xbf16>, vector<32x128xbf16>, vector<4x128xf32> -> vector<4x128xf32>
    %349 = arith.addf %346, %348 : vector<4x128xf32>
    %350 = vector.extract_strided_slice %349 {offsets = [0, 0], sizes = [4, 32], strides = [1, 1]} : vector<4x128xf32> to vector<4x32xf32>
    %351 = arith.negf %350 : vector<4x32xf32>
    %352 = math.exp %351 : vector<4x32xf32>
    %cst_65 = arith.constant 1.000000e+00 : f32
    %353 = vector.broadcast %cst_65 : f32 to vector<4x32xf32>
    %354 = arith.addf %353, %352 : vector<4x32xf32>
    %355 = arith.divf %353, %354 : vector<4x32xf32>
    %356 = vector.extract_strided_slice %349 {offsets = [0, 32], sizes = [4, 32], strides = [1, 1]} : vector<4x128xf32> to vector<4x32xf32>
    %357 = arith.negf %356 : vector<4x32xf32>
    %358 = math.exp %357 : vector<4x32xf32>
    %cst_66 = arith.constant 1.000000e+00 : f32
    %359 = vector.broadcast %cst_66 : f32 to vector<4x32xf32>
    %360 = arith.addf %359, %358 : vector<4x32xf32>
    %361 = arith.divf %359, %360 : vector<4x32xf32>
    %362 = vector.extract_strided_slice %349 {offsets = [0, 64], sizes = [4, 32], strides = [1, 1]} : vector<4x128xf32> to vector<4x32xf32>
    %363 = math.tanh %362 : vector<4x32xf32>
    %364 = vector.extract_strided_slice %349 {offsets = [0, 96], sizes = [4, 32], strides = [1, 1]} : vector<4x128xf32> to vector<4x32xf32>
    %365 = arith.negf %364 : vector<4x32xf32>
    %366 = math.exp %365 : vector<4x32xf32>
    %cst_67 = arith.constant 1.000000e+00 : f32
    %367 = vector.broadcast %cst_67 : f32 to vector<4x32xf32>
    %368 = arith.addf %367, %366 : vector<4x32xf32>
    %369 = arith.divf %367, %368 : vector<4x32xf32>
    %370 = arith.mulf %361, %343 : vector<4x32xf32>
    %371 = arith.mulf %355, %363 : vector<4x32xf32>
    %372 = arith.addf %370, %371 : vector<4x32xf32>
    %373 = math.tanh %372 : vector<4x32xf32>
    %374 = arith.mulf %369, %373 : vector<4x32xf32>
    %375 = vector.extract_strided_slice %18 {offsets = [12, 0], sizes = [4, 128], strides = [1, 1]} : vector<32x128xf32> to vector<4x128xf32>
    %376 = arith.truncf %374 : vector<4x32xf32> to vector<4x32xbf16>
    %cst_68 = arith.constant dense<0.000000e+00> : vector<4x128xf32>
    %377 = tpu.matmul %376, %24, %cst_68 {dimension_numbers = #tpu.dot_dimension_numbers<[1], [0], [0], [1], [0, 0, 1, 1], [], []>} : vector<4x32xbf16>, vector<32x128xbf16>, vector<4x128xf32> -> vector<4x128xf32>
    %378 = arith.addf %375, %377 : vector<4x128xf32>
    %379 = vector.extract_strided_slice %378 {offsets = [0, 0], sizes = [4, 32], strides = [1, 1]} : vector<4x128xf32> to vector<4x32xf32>
    %380 = arith.negf %379 : vector<4x32xf32>
    %381 = math.exp %380 : vector<4x32xf32>
    %cst_69 = arith.constant 1.000000e+00 : f32
    %382 = vector.broadcast %cst_69 : f32 to vector<4x32xf32>
    %383 = arith.addf %382, %381 : vector<4x32xf32>
    %384 = arith.divf %382, %383 : vector<4x32xf32>
    %385 = vector.extract_strided_slice %378 {offsets = [0, 32], sizes = [4, 32], strides = [1, 1]} : vector<4x128xf32> to vector<4x32xf32>
    %386 = arith.negf %385 : vector<4x32xf32>
    %387 = math.exp %386 : vector<4x32xf32>
    %cst_70 = arith.constant 1.000000e+00 : f32
    %388 = vector.broadcast %cst_70 : f32 to vector<4x32xf32>
    %389 = arith.addf %388, %387 : vector<4x32xf32>
    %390 = arith.divf %388, %389 : vector<4x32xf32>
    %391 = vector.extract_strided_slice %378 {offsets = [0, 64], sizes = [4, 32], strides = [1, 1]} : vector<4x128xf32> to vector<4x32xf32>
    %392 = math.tanh %391 : vector<4x32xf32>
    %393 = vector.extract_strided_slice %378 {offsets = [0, 96], sizes = [4, 32], strides = [1, 1]} : vector<4x128xf32> to vector<4x32xf32>
    %394 = arith.negf %393 : vector<4x32xf32>
    %395 = math.exp %394 : vector<4x32xf32>
    %cst_71 = arith.constant 1.000000e+00 : f32
    %396 = vector.broadcast %cst_71 : f32 to vector<4x32xf32>
    %397 = arith.addf %396, %395 : vector<4x32xf32>
    %398 = arith.divf %396, %397 : vector<4x32xf32>
    %399 = arith.mulf %390, %372 : vector<4x32xf32>
    %400 = arith.mulf %384, %392 : vector<4x32xf32>
    %401 = arith.addf %399, %400 : vector<4x32xf32>
    %402 = math.tanh %401 : vector<4x32xf32>
    %403 = arith.mulf %398, %402 : vector<4x32xf32>
    %404 = vector.extract_strided_slice %18 {offsets = [8, 0], sizes = [4, 128], strides = [1, 1]} : vector<32x128xf32> to vector<4x128xf32>
    %405 = arith.truncf %403 : vector<4x32xf32> to vector<4x32xbf16>
    %cst_72 = arith.constant dense<0.000000e+00> : vector<4x128xf32>
    %406 = tpu.matmul %405, %24, %cst_72 {dimension_numbers = #tpu.dot_dimension_numbers<[1], [0], [0], [1], [0, 0, 1, 1], [], []>} : vector<4x32xbf16>, vector<32x128xbf16>, vector<4x128xf32> -> vector<4x128xf32>
    %407 = arith.addf %404, %406 : vector<4x128xf32>
    %408 = vector.extract_strided_slice %407 {offsets = [0, 0], sizes = [4, 32], strides = [1, 1]} : vector<4x128xf32> to vector<4x32xf32>
    %409 = arith.negf %408 : vector<4x32xf32>
    %410 = math.exp %409 : vector<4x32xf32>
    %cst_73 = arith.constant 1.000000e+00 : f32
    %411 = vector.broadcast %cst_73 : f32 to vector<4x32xf32>
    %412 = arith.addf %411, %410 : vector<4x32xf32>
    %413 = arith.divf %411, %412 : vector<4x32xf32>
    %414 = vector.extract_strided_slice %407 {offsets = [0, 32], sizes = [4, 32], strides = [1, 1]} : vector<4x128xf32> to vector<4x32xf32>
    %415 = arith.negf %414 : vector<4x32xf32>
    %416 = math.exp %415 : vector<4x32xf32>
    %cst_74 = arith.constant 1.000000e+00 : f32
    %417 = vector.broadcast %cst_74 : f32 to vector<4x32xf32>
    %418 = arith.addf %417, %416 : vector<4x32xf32>
    %419 = arith.divf %417, %418 : vector<4x32xf32>
    %420 = vector.extract_strided_slice %407 {offsets = [0, 64], sizes = [4, 32], strides = [1, 1]} : vector<4x128xf32> to vector<4x32xf32>
    %421 = math.tanh %420 : vector<4x32xf32>
    %422 = vector.extract_strided_slice %407 {offsets = [0, 96], sizes = [4, 32], strides = [1, 1]} : vector<4x128xf32> to vector<4x32xf32>
    %423 = arith.negf %422 : vector<4x32xf32>
    %424 = math.exp %423 : vector<4x32xf32>
    %cst_75 = arith.constant 1.000000e+00 : f32
    %425 = vector.broadcast %cst_75 : f32 to vector<4x32xf32>
    %426 = arith.addf %425, %424 : vector<4x32xf32>
    %427 = arith.divf %425, %426 : vector<4x32xf32>
    %428 = arith.mulf %419, %401 : vector<4x32xf32>
    %429 = arith.mulf %413, %421 : vector<4x32xf32>
    %430 = arith.addf %428, %429 : vector<4x32xf32>
    %431 = math.tanh %430 : vector<4x32xf32>
    %432 = arith.mulf %427, %431 : vector<4x32xf32>
    %433 = vector.extract_strided_slice %18 {offsets = [4, 0], sizes = [4, 128], strides = [1, 1]} : vector<32x128xf32> to vector<4x128xf32>
    %434 = arith.truncf %432 : vector<4x32xf32> to vector<4x32xbf16>
    %cst_76 = arith.constant dense<0.000000e+00> : vector<4x128xf32>
    %435 = tpu.matmul %434, %24, %cst_76 {dimension_numbers = #tpu.dot_dimension_numbers<[1], [0], [0], [1], [0, 0, 1, 1], [], []>} : vector<4x32xbf16>, vector<32x128xbf16>, vector<4x128xf32> -> vector<4x128xf32>
    %436 = arith.addf %433, %435 : vector<4x128xf32>
    %437 = vector.extract_strided_slice %436 {offsets = [0, 0], sizes = [4, 32], strides = [1, 1]} : vector<4x128xf32> to vector<4x32xf32>
    %438 = arith.negf %437 : vector<4x32xf32>
    %439 = math.exp %438 : vector<4x32xf32>
    %cst_77 = arith.constant 1.000000e+00 : f32
    %440 = vector.broadcast %cst_77 : f32 to vector<4x32xf32>
    %441 = arith.addf %440, %439 : vector<4x32xf32>
    %442 = arith.divf %440, %441 : vector<4x32xf32>
    %443 = vector.extract_strided_slice %436 {offsets = [0, 32], sizes = [4, 32], strides = [1, 1]} : vector<4x128xf32> to vector<4x32xf32>
    %444 = arith.negf %443 : vector<4x32xf32>
    %445 = math.exp %444 : vector<4x32xf32>
    %cst_78 = arith.constant 1.000000e+00 : f32
    %446 = vector.broadcast %cst_78 : f32 to vector<4x32xf32>
    %447 = arith.addf %446, %445 : vector<4x32xf32>
    %448 = arith.divf %446, %447 : vector<4x32xf32>
    %449 = vector.extract_strided_slice %436 {offsets = [0, 64], sizes = [4, 32], strides = [1, 1]} : vector<4x128xf32> to vector<4x32xf32>
    %450 = math.tanh %449 : vector<4x32xf32>
    %451 = vector.extract_strided_slice %436 {offsets = [0, 96], sizes = [4, 32], strides = [1, 1]} : vector<4x128xf32> to vector<4x32xf32>
    %452 = arith.negf %451 : vector<4x32xf32>
    %453 = math.exp %452 : vector<4x32xf32>
    %cst_79 = arith.constant 1.000000e+00 : f32
    %454 = vector.broadcast %cst_79 : f32 to vector<4x32xf32>
    %455 = arith.addf %454, %453 : vector<4x32xf32>
    %456 = arith.divf %454, %455 : vector<4x32xf32>
    %457 = arith.mulf %448, %430 : vector<4x32xf32>
    %458 = arith.mulf %442, %450 : vector<4x32xf32>
    %459 = arith.addf %457, %458 : vector<4x32xf32>
    %460 = math.tanh %459 : vector<4x32xf32>
    %461 = arith.mulf %456, %460 : vector<4x32xf32>
    %462 = vector.extract_strided_slice %18 {offsets = [0, 0], sizes = [4, 128], strides = [1, 1]} : vector<32x128xf32> to vector<4x128xf32>
    %463 = arith.truncf %461 : vector<4x32xf32> to vector<4x32xbf16>
    %cst_80 = arith.constant dense<0.000000e+00> : vector<4x128xf32>
    %464 = tpu.matmul %463, %24, %cst_80 {dimension_numbers = #tpu.dot_dimension_numbers<[1], [0], [0], [1], [0, 0, 1, 1], [], []>} : vector<4x32xbf16>, vector<32x128xbf16>, vector<4x128xf32> -> vector<4x128xf32>
    %465 = arith.addf %462, %464 : vector<4x128xf32>
    %466 = vector.extract_strided_slice %465 {offsets = [0, 0], sizes = [4, 32], strides = [1, 1]} : vector<4x128xf32> to vector<4x32xf32>
    %467 = arith.negf %466 : vector<4x32xf32>
    %468 = math.exp %467 : vector<4x32xf32>
    %cst_81 = arith.constant 1.000000e+00 : f32
    %469 = vector.broadcast %cst_81 : f32 to vector<4x32xf32>
    %470 = arith.addf %469, %468 : vector<4x32xf32>
    %471 = arith.divf %469, %470 : vector<4x32xf32>
    %472 = vector.extract_strided_slice %465 {offsets = [0, 32], sizes = [4, 32], strides = [1, 1]} : vector<4x128xf32> to vector<4x32xf32>
    %473 = arith.negf %472 : vector<4x32xf32>
    %474 = math.exp %473 : vector<4x32xf32>
    %cst_82 = arith.constant 1.000000e+00 : f32
    %475 = vector.broadcast %cst_82 : f32 to vector<4x32xf32>
    %476 = arith.addf %475, %474 : vector<4x32xf32>
    %477 = arith.divf %475, %476 : vector<4x32xf32>
    %478 = vector.extract_strided_slice %465 {offsets = [0, 64], sizes = [4, 32], strides = [1, 1]} : vector<4x128xf32> to vector<4x32xf32>
    %479 = math.tanh %478 : vector<4x32xf32>
    %480 = vector.extract_strided_slice %465 {offsets = [0, 96], sizes = [4, 32], strides = [1, 1]} : vector<4x128xf32> to vector<4x32xf32>
    %481 = arith.negf %480 : vector<4x32xf32>
    %482 = math.exp %481 : vector<4x32xf32>
    %cst_83 = arith.constant 1.000000e+00 : f32
    %483 = vector.broadcast %cst_83 : f32 to vector<4x32xf32>
    %484 = arith.addf %483, %482 : vector<4x32xf32>
    %485 = arith.divf %483, %484 : vector<4x32xf32>
    %486 = arith.mulf %477, %459 : vector<4x32xf32>
    %487 = arith.mulf %471, %479 : vector<4x32xf32>
    %488 = arith.addf %486, %487 : vector<4x32xf32>
    %489 = math.tanh %488 : vector<4x32xf32>
    %490 = arith.mulf %485, %489 : vector<4x32xf32>
    %491 = tpu.concatenate %490, %461, %432, %403, %374, %345, %316, %287 in 0 : vector<4x32xf32>, vector<4x32xf32>, vector<4x32xf32>, vector<4x32xf32>, vector<4x32xf32>, vector<4x32xf32>, vector<4x32xf32>, vector<4x32xf32> -> vector<32x32xf32>
    %492 = arith.truncf %491 : vector<32x32xf32> to vector<32x32xbf16>
    %c0_84 = arith.constant 0 : index
    %c0_85 = arith.constant 0 : index
    %c0_86 = arith.constant 0 : index
    %493 = vector.load %arg7[%c0_84, %c0_85, %c0_86] : memref<2x1x128xf32, #tpu.memory_space<vmem>>, vector<1x1x128xf32>
    %494 = vector.shape_cast %493 : vector<1x1x128xf32> to vector<1x128xf32>
    %c0_87 = arith.constant 0 : index
    %c0_88 = arith.constant 0 : index
    %c0_89 = arith.constant 0 : index
    %495 = vector.load %arg5[%c0_87, %c0_88, %c0_89] : memref<2x64x128xf32, #tpu.memory_space<vmem>>, vector<1x32x128xf32>
    %496 = vector.shape_cast %495 : vector<1x32x128xf32> to vector<32x128xf32>
    %497 = arith.truncf %496 : vector<32x128xf32> to vector<32x128xbf16>
    %cst_90 = arith.constant dense<0.000000e+00> : vector<32x128xf32>
    %498 = tpu.matmul %258, %497, %cst_90 {dimension_numbers = #tpu.dot_dimension_numbers<[1], [0], [0], [1], [0, 0, 1, 1], [], []>} : vector<32x32xbf16>, vector<32x128xbf16>, vector<32x128xf32> -> vector<32x128xf32>
    %499 = vector.broadcast %494 : vector<1x128xf32> to vector<32x128xf32>
    %500 = arith.addf %499, %498 : vector<32x128xf32>
    %c0_91 = arith.constant 0 : index
    %c32 = arith.constant 32 : index
    %c0_92 = arith.constant 0 : index
    %501 = vector.load %arg5[%c0_91, %c32, %c0_92] : memref<2x64x128xf32, #tpu.memory_space<vmem>>, vector<1x32x128xf32>
    %502 = vector.shape_cast %501 : vector<1x32x128xf32> to vector<32x128xf32>
    %503 = arith.truncf %502 : vector<32x128xf32> to vector<32x128xbf16>
    %cst_93 = arith.constant dense<0.000000e+00> : vector<32x128xf32>
    %504 = tpu.matmul %492, %503, %cst_93 {dimension_numbers = #tpu.dot_dimension_numbers<[1], [0], [0], [1], [0, 0, 1, 1], [], []>} : vector<32x32xbf16>, vector<32x128xbf16>, vector<32x128xf32> -> vector<32x128xf32>
    %505 = arith.addf %500, %504 : vector<32x128xf32>
    %c1_94 = arith.constant 1 : index
    %c0_95 = arith.constant 0 : index
    %c0_96 = arith.constant 0 : index
    %506 = vector.load %arg7[%c1_94, %c0_95, %c0_96] : memref<2x1x128xf32, #tpu.memory_space<vmem>>, vector<1x1x128xf32>
    %507 = vector.shape_cast %506 : vector<1x1x128xf32> to vector<1x128xf32>
    %c1_97 = arith.constant 1 : index
    %c0_98 = arith.constant 0 : index
    %c0_99 = arith.constant 0 : index
    %508 = vector.load %arg5[%c1_97, %c0_98, %c0_99] : memref<2x64x128xf32, #tpu.memory_space<vmem>>, vector<1x32x128xf32>
    %509 = vector.shape_cast %508 : vector<1x32x128xf32> to vector<32x128xf32>
    %510 = arith.truncf %509 : vector<32x128xf32> to vector<32x128xbf16>
    %cst_100 = arith.constant dense<0.000000e+00> : vector<32x128xf32>
    %511 = tpu.matmul %258, %510, %cst_100 {dimension_numbers = #tpu.dot_dimension_numbers<[1], [0], [0], [1], [0, 0, 1, 1], [], []>} : vector<32x32xbf16>, vector<32x128xbf16>, vector<32x128xf32> -> vector<32x128xf32>
    %512 = vector.broadcast %507 : vector<1x128xf32> to vector<32x128xf32>
    %513 = arith.addf %512, %511 : vector<32x128xf32>
    %c1_101 = arith.constant 1 : index
    %c32_102 = arith.constant 32 : index
    %c0_103 = arith.constant 0 : index
    %514 = vector.load %arg5[%c1_101, %c32_102, %c0_103] : memref<2x64x128xf32, #tpu.memory_space<vmem>>, vector<1x32x128xf32>
    %515 = vector.shape_cast %514 : vector<1x32x128xf32> to vector<32x128xf32>
    %516 = arith.truncf %515 : vector<32x128xf32> to vector<32x128xbf16>
    %cst_104 = arith.constant dense<0.000000e+00> : vector<32x128xf32>
    %517 = tpu.matmul %492, %516, %cst_104 {dimension_numbers = #tpu.dot_dimension_numbers<[1], [0], [0], [1], [0, 0, 1, 1], [], []>} : vector<32x32xbf16>, vector<32x128xbf16>, vector<32x128xf32> -> vector<32x128xf32>
    %518 = arith.addf %513, %517 : vector<32x128xf32>
    %c0_105 = arith.constant 0 : index
    %c0_106 = arith.constant 0 : index
    %c0_107 = arith.constant 0 : index
    %519 = vector.load %arg6[%c0_105, %c0_106, %c0_107] : memref<2x32x128xf32, #tpu.memory_space<vmem>>, vector<1x32x128xf32>
    %520 = vector.shape_cast %519 : vector<1x32x128xf32> to vector<32x128xf32>
    %521 = arith.truncf %520 : vector<32x128xf32> to vector<32x128xbf16>
    %c1_108 = arith.constant 1 : index
    %c0_109 = arith.constant 0 : index
    %c0_110 = arith.constant 0 : index
    %522 = vector.load %arg6[%c1_108, %c0_109, %c0_110] : memref<2x32x128xf32, #tpu.memory_space<vmem>>, vector<1x32x128xf32>
    %523 = vector.shape_cast %522 : vector<1x32x128xf32> to vector<32x128xf32>
    %524 = arith.truncf %523 : vector<32x128xf32> to vector<32x128xbf16>
    %525 = vector.extract_strided_slice %505 {offsets = [0, 0], sizes = [4, 128], strides = [1, 1]} : vector<32x128xf32> to vector<4x128xf32>
    %526 = arith.truncf %2 : vector<4x32xf32> to vector<4x32xbf16>
    %cst_111 = arith.constant dense<0.000000e+00> : vector<4x128xf32>
    %527 = tpu.matmul %526, %521, %cst_111 {dimension_numbers = #tpu.dot_dimension_numbers<[1], [0], [0], [1], [0, 0, 1, 1], [], []>} : vector<4x32xbf16>, vector<32x128xbf16>, vector<4x128xf32> -> vector<4x128xf32>
    %528 = arith.addf %525, %527 : vector<4x128xf32>
    %529 = vector.extract_strided_slice %528 {offsets = [0, 0], sizes = [4, 32], strides = [1, 1]} : vector<4x128xf32> to vector<4x32xf32>
    %530 = arith.negf %529 : vector<4x32xf32>
    %531 = math.exp %530 : vector<4x32xf32>
    %cst_112 = arith.constant 1.000000e+00 : f32
    %532 = vector.broadcast %cst_112 : f32 to vector<4x32xf32>
    %533 = arith.addf %532, %531 : vector<4x32xf32>
    %534 = arith.divf %532, %533 : vector<4x32xf32>
    %535 = vector.extract_strided_slice %528 {offsets = [0, 32], sizes = [4, 32], strides = [1, 1]} : vector<4x128xf32> to vector<4x32xf32>
    %536 = arith.negf %535 : vector<4x32xf32>
    %537 = math.exp %536 : vector<4x32xf32>
    %cst_113 = arith.constant 1.000000e+00 : f32
    %538 = vector.broadcast %cst_113 : f32 to vector<4x32xf32>
    %539 = arith.addf %538, %537 : vector<4x32xf32>
    %540 = arith.divf %538, %539 : vector<4x32xf32>
    %541 = vector.extract_strided_slice %528 {offsets = [0, 64], sizes = [4, 32], strides = [1, 1]} : vector<4x128xf32> to vector<4x32xf32>
    %542 = math.tanh %541 : vector<4x32xf32>
    %543 = vector.extract_strided_slice %528 {offsets = [0, 96], sizes = [4, 32], strides = [1, 1]} : vector<4x128xf32> to vector<4x32xf32>
    %544 = arith.negf %543 : vector<4x32xf32>
    %545 = math.exp %544 : vector<4x32xf32>
    %cst_114 = arith.constant 1.000000e+00 : f32
    %546 = vector.broadcast %cst_114 : f32 to vector<4x32xf32>
    %547 = arith.addf %546, %545 : vector<4x32xf32>
    %548 = arith.divf %546, %547 : vector<4x32xf32>
    %549 = arith.mulf %540, %2 : vector<4x32xf32>
    %550 = arith.mulf %534, %542 : vector<4x32xf32>
    %551 = arith.addf %549, %550 : vector<4x32xf32>
    %552 = math.tanh %551 : vector<4x32xf32>
    %553 = arith.mulf %548, %552 : vector<4x32xf32>
    %554 = vector.extract_strided_slice %505 {offsets = [4, 0], sizes = [4, 128], strides = [1, 1]} : vector<32x128xf32> to vector<4x128xf32>
    %555 = arith.truncf %553 : vector<4x32xf32> to vector<4x32xbf16>
    %cst_115 = arith.constant dense<0.000000e+00> : vector<4x128xf32>
    %556 = tpu.matmul %555, %521, %cst_115 {dimension_numbers = #tpu.dot_dimension_numbers<[1], [0], [0], [1], [0, 0, 1, 1], [], []>} : vector<4x32xbf16>, vector<32x128xbf16>, vector<4x128xf32> -> vector<4x128xf32>
    %557 = arith.addf %554, %556 : vector<4x128xf32>
    %558 = vector.extract_strided_slice %557 {offsets = [0, 0], sizes = [4, 32], strides = [1, 1]} : vector<4x128xf32> to vector<4x32xf32>
    %559 = arith.negf %558 : vector<4x32xf32>
    %560 = math.exp %559 : vector<4x32xf32>
    %cst_116 = arith.constant 1.000000e+00 : f32
    %561 = vector.broadcast %cst_116 : f32 to vector<4x32xf32>
    %562 = arith.addf %561, %560 : vector<4x32xf32>
    %563 = arith.divf %561, %562 : vector<4x32xf32>
    %564 = vector.extract_strided_slice %557 {offsets = [0, 32], sizes = [4, 32], strides = [1, 1]} : vector<4x128xf32> to vector<4x32xf32>
    %565 = arith.negf %564 : vector<4x32xf32>
    %566 = math.exp %565 : vector<4x32xf32>
    %cst_117 = arith.constant 1.000000e+00 : f32
    %567 = vector.broadcast %cst_117 : f32 to vector<4x32xf32>
    %568 = arith.addf %567, %566 : vector<4x32xf32>
    %569 = arith.divf %567, %568 : vector<4x32xf32>
    %570 = vector.extract_strided_slice %557 {offsets = [0, 64], sizes = [4, 32], strides = [1, 1]} : vector<4x128xf32> to vector<4x32xf32>
    %571 = math.tanh %570 : vector<4x32xf32>
    %572 = vector.extract_strided_slice %557 {offsets = [0, 96], sizes = [4, 32], strides = [1, 1]} : vector<4x128xf32> to vector<4x32xf32>
    %573 = arith.negf %572 : vector<4x32xf32>
    %574 = math.exp %573 : vector<4x32xf32>
    %cst_118 = arith.constant 1.000000e+00 : f32
    %575 = vector.broadcast %cst_118 : f32 to vector<4x32xf32>
    %576 = arith.addf %575, %574 : vector<4x32xf32>
    %577 = arith.divf %575, %576 : vector<4x32xf32>
    %578 = arith.mulf %569, %551 : vector<4x32xf32>
    %579 = arith.mulf %563, %571 : vector<4x32xf32>
    %580 = arith.addf %578, %579 : vector<4x32xf32>
    %581 = math.tanh %580 : vector<4x32xf32>
    %582 = arith.mulf %577, %581 : vector<4x32xf32>
    %583 = vector.extract_strided_slice %505 {offsets = [8, 0], sizes = [4, 128], strides = [1, 1]} : vector<32x128xf32> to vector<4x128xf32>
    %584 = arith.truncf %582 : vector<4x32xf32> to vector<4x32xbf16>
    %cst_119 = arith.constant dense<0.000000e+00> : vector<4x128xf32>
    %585 = tpu.matmul %584, %521, %cst_119 {dimension_numbers = #tpu.dot_dimension_numbers<[1], [0], [0], [1], [0, 0, 1, 1], [], []>} : vector<4x32xbf16>, vector<32x128xbf16>, vector<4x128xf32> -> vector<4x128xf32>
    %586 = arith.addf %583, %585 : vector<4x128xf32>
    %587 = vector.extract_strided_slice %586 {offsets = [0, 0], sizes = [4, 32], strides = [1, 1]} : vector<4x128xf32> to vector<4x32xf32>
    %588 = arith.negf %587 : vector<4x32xf32>
    %589 = math.exp %588 : vector<4x32xf32>
    %cst_120 = arith.constant 1.000000e+00 : f32
    %590 = vector.broadcast %cst_120 : f32 to vector<4x32xf32>
    %591 = arith.addf %590, %589 : vector<4x32xf32>
    %592 = arith.divf %590, %591 : vector<4x32xf32>
    %593 = vector.extract_strided_slice %586 {offsets = [0, 32], sizes = [4, 32], strides = [1, 1]} : vector<4x128xf32> to vector<4x32xf32>
    %594 = arith.negf %593 : vector<4x32xf32>
    %595 = math.exp %594 : vector<4x32xf32>
    %cst_121 = arith.constant 1.000000e+00 : f32
    %596 = vector.broadcast %cst_121 : f32 to vector<4x32xf32>
    %597 = arith.addf %596, %595 : vector<4x32xf32>
    %598 = arith.divf %596, %597 : vector<4x32xf32>
    %599 = vector.extract_strided_slice %586 {offsets = [0, 64], sizes = [4, 32], strides = [1, 1]} : vector<4x128xf32> to vector<4x32xf32>
    %600 = math.tanh %599 : vector<4x32xf32>
    %601 = vector.extract_strided_slice %586 {offsets = [0, 96], sizes = [4, 32], strides = [1, 1]} : vector<4x128xf32> to vector<4x32xf32>
    %602 = arith.negf %601 : vector<4x32xf32>
    %603 = math.exp %602 : vector<4x32xf32>
    %cst_122 = arith.constant 1.000000e+00 : f32
    %604 = vector.broadcast %cst_122 : f32 to vector<4x32xf32>
    %605 = arith.addf %604, %603 : vector<4x32xf32>
    %606 = arith.divf %604, %605 : vector<4x32xf32>
    %607 = arith.mulf %598, %580 : vector<4x32xf32>
    %608 = arith.mulf %592, %600 : vector<4x32xf32>
    %609 = arith.addf %607, %608 : vector<4x32xf32>
    %610 = math.tanh %609 : vector<4x32xf32>
    %611 = arith.mulf %606, %610 : vector<4x32xf32>
    %612 = vector.extract_strided_slice %505 {offsets = [12, 0], sizes = [4, 128], strides = [1, 1]} : vector<32x128xf32> to vector<4x128xf32>
    %613 = arith.truncf %611 : vector<4x32xf32> to vector<4x32xbf16>
    %cst_123 = arith.constant dense<0.000000e+00> : vector<4x128xf32>
    %614 = tpu.matmul %613, %521, %cst_123 {dimension_numbers = #tpu.dot_dimension_numbers<[1], [0], [0], [1], [0, 0, 1, 1], [], []>} : vector<4x32xbf16>, vector<32x128xbf16>, vector<4x128xf32> -> vector<4x128xf32>
    %615 = arith.addf %612, %614 : vector<4x128xf32>
    %616 = vector.extract_strided_slice %615 {offsets = [0, 0], sizes = [4, 32], strides = [1, 1]} : vector<4x128xf32> to vector<4x32xf32>
    %617 = arith.negf %616 : vector<4x32xf32>
    %618 = math.exp %617 : vector<4x32xf32>
    %cst_124 = arith.constant 1.000000e+00 : f32
    %619 = vector.broadcast %cst_124 : f32 to vector<4x32xf32>
    %620 = arith.addf %619, %618 : vector<4x32xf32>
    %621 = arith.divf %619, %620 : vector<4x32xf32>
    %622 = vector.extract_strided_slice %615 {offsets = [0, 32], sizes = [4, 32], strides = [1, 1]} : vector<4x128xf32> to vector<4x32xf32>
    %623 = arith.negf %622 : vector<4x32xf32>
    %624 = math.exp %623 : vector<4x32xf32>
    %cst_125 = arith.constant 1.000000e+00 : f32
    %625 = vector.broadcast %cst_125 : f32 to vector<4x32xf32>
    %626 = arith.addf %625, %624 : vector<4x32xf32>
    %627 = arith.divf %625, %626 : vector<4x32xf32>
    %628 = vector.extract_strided_slice %615 {offsets = [0, 64], sizes = [4, 32], strides = [1, 1]} : vector<4x128xf32> to vector<4x32xf32>
    %629 = math.tanh %628 : vector<4x32xf32>
    %630 = vector.extract_strided_slice %615 {offsets = [0, 96], sizes = [4, 32], strides = [1, 1]} : vector<4x128xf32> to vector<4x32xf32>
    %631 = arith.negf %630 : vector<4x32xf32>
    %632 = math.exp %631 : vector<4x32xf32>
    %cst_126 = arith.constant 1.000000e+00 : f32
    %633 = vector.broadcast %cst_126 : f32 to vector<4x32xf32>
    %634 = arith.addf %633, %632 : vector<4x32xf32>
    %635 = arith.divf %633, %634 : vector<4x32xf32>
    %636 = arith.mulf %627, %609 : vector<4x32xf32>
    %637 = arith.mulf %621, %629 : vector<4x32xf32>
    %638 = arith.addf %636, %637 : vector<4x32xf32>
    %639 = math.tanh %638 : vector<4x32xf32>
    %640 = arith.mulf %635, %639 : vector<4x32xf32>
    %641 = vector.extract_strided_slice %505 {offsets = [16, 0], sizes = [4, 128], strides = [1, 1]} : vector<32x128xf32> to vector<4x128xf32>
    %642 = arith.truncf %640 : vector<4x32xf32> to vector<4x32xbf16>
    %cst_127 = arith.constant dense<0.000000e+00> : vector<4x128xf32>
    %643 = tpu.matmul %642, %521, %cst_127 {dimension_numbers = #tpu.dot_dimension_numbers<[1], [0], [0], [1], [0, 0, 1, 1], [], []>} : vector<4x32xbf16>, vector<32x128xbf16>, vector<4x128xf32> -> vector<4x128xf32>
    %644 = arith.addf %641, %643 : vector<4x128xf32>
    %645 = vector.extract_strided_slice %644 {offsets = [0, 0], sizes = [4, 32], strides = [1, 1]} : vector<4x128xf32> to vector<4x32xf32>
    %646 = arith.negf %645 : vector<4x32xf32>
    %647 = math.exp %646 : vector<4x32xf32>
    %cst_128 = arith.constant 1.000000e+00 : f32
    %648 = vector.broadcast %cst_128 : f32 to vector<4x32xf32>
    %649 = arith.addf %648, %647 : vector<4x32xf32>
    %650 = arith.divf %648, %649 : vector<4x32xf32>
    %651 = vector.extract_strided_slice %644 {offsets = [0, 32], sizes = [4, 32], strides = [1, 1]} : vector<4x128xf32> to vector<4x32xf32>
    %652 = arith.negf %651 : vector<4x32xf32>
    %653 = math.exp %652 : vector<4x32xf32>
    %cst_129 = arith.constant 1.000000e+00 : f32
    %654 = vector.broadcast %cst_129 : f32 to vector<4x32xf32>
    %655 = arith.addf %654, %653 : vector<4x32xf32>
    %656 = arith.divf %654, %655 : vector<4x32xf32>
    %657 = vector.extract_strided_slice %644 {offsets = [0, 64], sizes = [4, 32], strides = [1, 1]} : vector<4x128xf32> to vector<4x32xf32>
    %658 = math.tanh %657 : vector<4x32xf32>
    %659 = vector.extract_strided_slice %644 {offsets = [0, 96], sizes = [4, 32], strides = [1, 1]} : vector<4x128xf32> to vector<4x32xf32>
    %660 = arith.negf %659 : vector<4x32xf32>
    %661 = math.exp %660 : vector<4x32xf32>
    %cst_130 = arith.constant 1.000000e+00 : f32
    %662 = vector.broadcast %cst_130 : f32 to vector<4x32xf32>
    %663 = arith.addf %662, %661 : vector<4x32xf32>
    %664 = arith.divf %662, %663 : vector<4x32xf32>
    %665 = arith.mulf %656, %638 : vector<4x32xf32>
    %666 = arith.mulf %650, %658 : vector<4x32xf32>
    %667 = arith.addf %665, %666 : vector<4x32xf32>
    %668 = math.tanh %667 : vector<4x32xf32>
    %669 = arith.mulf %664, %668 : vector<4x32xf32>
    %670 = vector.extract_strided_slice %505 {offsets = [20, 0], sizes = [4, 128], strides = [1, 1]} : vector<32x128xf32> to vector<4x128xf32>
    %671 = arith.truncf %669 : vector<4x32xf32> to vector<4x32xbf16>
    %cst_131 = arith.constant dense<0.000000e+00> : vector<4x128xf32>
    %672 = tpu.matmul %671, %521, %cst_131 {dimension_numbers = #tpu.dot_dimension_numbers<[1], [0], [0], [1], [0, 0, 1, 1], [], []>} : vector<4x32xbf16>, vector<32x128xbf16>, vector<4x128xf32> -> vector<4x128xf32>
    %673 = arith.addf %670, %672 : vector<4x128xf32>
    %674 = vector.extract_strided_slice %673 {offsets = [0, 0], sizes = [4, 32], strides = [1, 1]} : vector<4x128xf32> to vector<4x32xf32>
    %675 = arith.negf %674 : vector<4x32xf32>
    %676 = math.exp %675 : vector<4x32xf32>
    %cst_132 = arith.constant 1.000000e+00 : f32
    %677 = vector.broadcast %cst_132 : f32 to vector<4x32xf32>
    %678 = arith.addf %677, %676 : vector<4x32xf32>
    %679 = arith.divf %677, %678 : vector<4x32xf32>
    %680 = vector.extract_strided_slice %673 {offsets = [0, 32], sizes = [4, 32], strides = [1, 1]} : vector<4x128xf32> to vector<4x32xf32>
    %681 = arith.negf %680 : vector<4x32xf32>
    %682 = math.exp %681 : vector<4x32xf32>
    %cst_133 = arith.constant 1.000000e+00 : f32
    %683 = vector.broadcast %cst_133 : f32 to vector<4x32xf32>
    %684 = arith.addf %683, %682 : vector<4x32xf32>
    %685 = arith.divf %683, %684 : vector<4x32xf32>
    %686 = vector.extract_strided_slice %673 {offsets = [0, 64], sizes = [4, 32], strides = [1, 1]} : vector<4x128xf32> to vector<4x32xf32>
    %687 = math.tanh %686 : vector<4x32xf32>
    %688 = vector.extract_strided_slice %673 {offsets = [0, 96], sizes = [4, 32], strides = [1, 1]} : vector<4x128xf32> to vector<4x32xf32>
    %689 = arith.negf %688 : vector<4x32xf32>
    %690 = math.exp %689 : vector<4x32xf32>
    %cst_134 = arith.constant 1.000000e+00 : f32
    %691 = vector.broadcast %cst_134 : f32 to vector<4x32xf32>
    %692 = arith.addf %691, %690 : vector<4x32xf32>
    %693 = arith.divf %691, %692 : vector<4x32xf32>
    %694 = arith.mulf %685, %667 : vector<4x32xf32>
    %695 = arith.mulf %679, %687 : vector<4x32xf32>
    %696 = arith.addf %694, %695 : vector<4x32xf32>
    %697 = math.tanh %696 : vector<4x32xf32>
    %698 = arith.mulf %693, %697 : vector<4x32xf32>
    %699 = vector.extract_strided_slice %505 {offsets = [24, 0], sizes = [4, 128], strides = [1, 1]} : vector<32x128xf32> to vector<4x128xf32>
    %700 = arith.truncf %698 : vector<4x32xf32> to vector<4x32xbf16>
    %cst_135 = arith.constant dense<0.000000e+00> : vector<4x128xf32>
    %701 = tpu.matmul %700, %521, %cst_135 {dimension_numbers = #tpu.dot_dimension_numbers<[1], [0], [0], [1], [0, 0, 1, 1], [], []>} : vector<4x32xbf16>, vector<32x128xbf16>, vector<4x128xf32> -> vector<4x128xf32>
    %702 = arith.addf %699, %701 : vector<4x128xf32>
    %703 = vector.extract_strided_slice %702 {offsets = [0, 0], sizes = [4, 32], strides = [1, 1]} : vector<4x128xf32> to vector<4x32xf32>
    %704 = arith.negf %703 : vector<4x32xf32>
    %705 = math.exp %704 : vector<4x32xf32>
    %cst_136 = arith.constant 1.000000e+00 : f32
    %706 = vector.broadcast %cst_136 : f32 to vector<4x32xf32>
    %707 = arith.addf %706, %705 : vector<4x32xf32>
    %708 = arith.divf %706, %707 : vector<4x32xf32>
    %709 = vector.extract_strided_slice %702 {offsets = [0, 32], sizes = [4, 32], strides = [1, 1]} : vector<4x128xf32> to vector<4x32xf32>
    %710 = arith.negf %709 : vector<4x32xf32>
    %711 = math.exp %710 : vector<4x32xf32>
    %cst_137 = arith.constant 1.000000e+00 : f32
    %712 = vector.broadcast %cst_137 : f32 to vector<4x32xf32>
    %713 = arith.addf %712, %711 : vector<4x32xf32>
    %714 = arith.divf %712, %713 : vector<4x32xf32>
    %715 = vector.extract_strided_slice %702 {offsets = [0, 64], sizes = [4, 32], strides = [1, 1]} : vector<4x128xf32> to vector<4x32xf32>
    %716 = math.tanh %715 : vector<4x32xf32>
    %717 = vector.extract_strided_slice %702 {offsets = [0, 96], sizes = [4, 32], strides = [1, 1]} : vector<4x128xf32> to vector<4x32xf32>
    %718 = arith.negf %717 : vector<4x32xf32>
    %719 = math.exp %718 : vector<4x32xf32>
    %cst_138 = arith.constant 1.000000e+00 : f32
    %720 = vector.broadcast %cst_138 : f32 to vector<4x32xf32>
    %721 = arith.addf %720, %719 : vector<4x32xf32>
    %722 = arith.divf %720, %721 : vector<4x32xf32>
    %723 = arith.mulf %714, %696 : vector<4x32xf32>
    %724 = arith.mulf %708, %716 : vector<4x32xf32>
    %725 = arith.addf %723, %724 : vector<4x32xf32>
    %726 = math.tanh %725 : vector<4x32xf32>
    %727 = arith.mulf %722, %726 : vector<4x32xf32>
    %728 = vector.extract_strided_slice %505 {offsets = [28, 0], sizes = [4, 128], strides = [1, 1]} : vector<32x128xf32> to vector<4x128xf32>
    %729 = arith.truncf %727 : vector<4x32xf32> to vector<4x32xbf16>
    %cst_139 = arith.constant dense<0.000000e+00> : vector<4x128xf32>
    %730 = tpu.matmul %729, %521, %cst_139 {dimension_numbers = #tpu.dot_dimension_numbers<[1], [0], [0], [1], [0, 0, 1, 1], [], []>} : vector<4x32xbf16>, vector<32x128xbf16>, vector<4x128xf32> -> vector<4x128xf32>
    %731 = arith.addf %728, %730 : vector<4x128xf32>
    %732 = vector.extract_strided_slice %731 {offsets = [0, 0], sizes = [4, 32], strides = [1, 1]} : vector<4x128xf32> to vector<4x32xf32>
    %733 = arith.negf %732 : vector<4x32xf32>
    %734 = math.exp %733 : vector<4x32xf32>
    %cst_140 = arith.constant 1.000000e+00 : f32
    %735 = vector.broadcast %cst_140 : f32 to vector<4x32xf32>
    %736 = arith.addf %735, %734 : vector<4x32xf32>
    %737 = arith.divf %735, %736 : vector<4x32xf32>
    %738 = vector.extract_strided_slice %731 {offsets = [0, 32], sizes = [4, 32], strides = [1, 1]} : vector<4x128xf32> to vector<4x32xf32>
    %739 = arith.negf %738 : vector<4x32xf32>
    %740 = math.exp %739 : vector<4x32xf32>
    %cst_141 = arith.constant 1.000000e+00 : f32
    %741 = vector.broadcast %cst_141 : f32 to vector<4x32xf32>
    %742 = arith.addf %741, %740 : vector<4x32xf32>
    %743 = arith.divf %741, %742 : vector<4x32xf32>
    %744 = vector.extract_strided_slice %731 {offsets = [0, 64], sizes = [4, 32], strides = [1, 1]} : vector<4x128xf32> to vector<4x32xf32>
    %745 = math.tanh %744 : vector<4x32xf32>
    %746 = vector.extract_strided_slice %731 {offsets = [0, 96], sizes = [4, 32], strides = [1, 1]} : vector<4x128xf32> to vector<4x32xf32>
    %747 = arith.negf %746 : vector<4x32xf32>
    %748 = math.exp %747 : vector<4x32xf32>
    %cst_142 = arith.constant 1.000000e+00 : f32
    %749 = vector.broadcast %cst_142 : f32 to vector<4x32xf32>
    %750 = arith.addf %749, %748 : vector<4x32xf32>
    %751 = arith.divf %749, %750 : vector<4x32xf32>
    %752 = arith.mulf %743, %725 : vector<4x32xf32>
    %753 = arith.mulf %737, %745 : vector<4x32xf32>
    %754 = arith.addf %752, %753 : vector<4x32xf32>
    %755 = math.tanh %754 : vector<4x32xf32>
    %756 = arith.mulf %751, %755 : vector<4x32xf32>
    %757 = vector.extract_strided_slice %518 {offsets = [28, 0], sizes = [4, 128], strides = [1, 1]} : vector<32x128xf32> to vector<4x128xf32>
    %758 = arith.truncf %2 : vector<4x32xf32> to vector<4x32xbf16>
    %cst_143 = arith.constant dense<0.000000e+00> : vector<4x128xf32>
    %759 = tpu.matmul %758, %524, %cst_143 {dimension_numbers = #tpu.dot_dimension_numbers<[1], [0], [0], [1], [0, 0, 1, 1], [], []>} : vector<4x32xbf16>, vector<32x128xbf16>, vector<4x128xf32> -> vector<4x128xf32>
    %760 = arith.addf %757, %759 : vector<4x128xf32>
    %761 = vector.extract_strided_slice %760 {offsets = [0, 0], sizes = [4, 32], strides = [1, 1]} : vector<4x128xf32> to vector<4x32xf32>
    %762 = arith.negf %761 : vector<4x32xf32>
    %763 = math.exp %762 : vector<4x32xf32>
    %cst_144 = arith.constant 1.000000e+00 : f32
    %764 = vector.broadcast %cst_144 : f32 to vector<4x32xf32>
    %765 = arith.addf %764, %763 : vector<4x32xf32>
    %766 = arith.divf %764, %765 : vector<4x32xf32>
    %767 = vector.extract_strided_slice %760 {offsets = [0, 32], sizes = [4, 32], strides = [1, 1]} : vector<4x128xf32> to vector<4x32xf32>
    %768 = arith.negf %767 : vector<4x32xf32>
    %769 = math.exp %768 : vector<4x32xf32>
    %cst_145 = arith.constant 1.000000e+00 : f32
    %770 = vector.broadcast %cst_145 : f32 to vector<4x32xf32>
    %771 = arith.addf %770, %769 : vector<4x32xf32>
    %772 = arith.divf %770, %771 : vector<4x32xf32>
    %773 = vector.extract_strided_slice %760 {offsets = [0, 64], sizes = [4, 32], strides = [1, 1]} : vector<4x128xf32> to vector<4x32xf32>
    %774 = math.tanh %773 : vector<4x32xf32>
    %775 = vector.extract_strided_slice %760 {offsets = [0, 96], sizes = [4, 32], strides = [1, 1]} : vector<4x128xf32> to vector<4x32xf32>
    %776 = arith.negf %775 : vector<4x32xf32>
    %777 = math.exp %776 : vector<4x32xf32>
    %cst_146 = arith.constant 1.000000e+00 : f32
    %778 = vector.broadcast %cst_146 : f32 to vector<4x32xf32>
    %779 = arith.addf %778, %777 : vector<4x32xf32>
    %780 = arith.divf %778, %779 : vector<4x32xf32>
    %781 = arith.mulf %772, %2 : vector<4x32xf32>
    %782 = arith.mulf %766, %774 : vector<4x32xf32>
    %783 = arith.addf %781, %782 : vector<4x32xf32>
    %784 = math.tanh %783 : vector<4x32xf32>
    %785 = arith.mulf %780, %784 : vector<4x32xf32>
    %786 = tpu.concatenate %756, %785 in 1 : vector<4x32xf32>, vector<4x32xf32> -> vector<4x64xf32>
    %c0_147 = arith.constant 0 : index
    %c0_148 = arith.constant 0 : index
    %787 = vector.load %arg8[%c0_147, %c0_148] : memref<4x64xf32, #tpu.memory_space<vmem>>, vector<4x64xf32>
    tpu.vector_store %arg8[%c0_147, %c0_148], %786 {strides = array<i32>} : memref<4x64xf32, #tpu.memory_space<vmem>>, vector<4x64xf32>,
    return
  }
  func.func @transform_0(%arg0: i32) -> (i32, i32) {
    %c0_i32 = arith.constant 0 : i32
    %c0_i32_0 = arith.constant 0 : i32
    %c0_i32_1 = arith.constant 0 : i32
    return %c0_i32, %c0_i32_0 : i32, i32
  }
  func.func @transform_1(%arg0: i32) -> (i32, i32, i32) {
    %c0_i32 = arith.constant 0 : i32
    %c0_i32_0 = arith.constant 0 : i32
    %c0_i32_1 = arith.constant 0 : i32
    %c0_i32_2 = arith.constant 0 : i32
    return %c0_i32, %c0_i32_0, %c0_i32_1 : i32, i32, i32
  }
  func.func @transform_2(%arg0: i32) -> (i32, i32, i32) {
    %c0_i32 = arith.constant 0 : i32
    %c0_i32_0 = arith.constant 0 : i32
    %c0_i32_1 = arith.constant 0 : i32
    %c0_i32_2 = arith.constant 0 : i32
    return %c0_i32, %c0_i32_0, %c0_i32_1 : i32, i32, i32
  }
  func.func @transform_3(%arg0: i32) -> (i32, i32, i32) {
    %c0_i32 = arith.constant 0 : i32
    %c0_i32_0 = arith.constant 0 : i32
    %c0_i32_1 = arith.constant 0 : i32
    %c0_i32_2 = arith.constant 0 : i32
    return %c0_i32, %c0_i32_0, %c0_i32_1 : i32, i32, i32
  }
  func.func @transform_4(%arg0: i32) -> (i32, i32, i32) {
    %c0_i32 = arith.constant 0 : i32
    %c0_i32_0 = arith.constant 0 : i32
    %c0_i32_1 = arith.constant 0 : i32
    %c0_i32_2 = arith.constant 0 : i32
    return %c0_i32, %c0_i32_0, %c0_i32_1 : i32, i32, i32
  }
  func.func @transform_5(%arg0: i32) -> (i32, i32, i32) {
    %c0_i32 = arith.constant 0 : i32
    %c0_i32_0 = arith.constant 0 : i32
    %c0_i32_1 = arith.constant 0 : i32
    %c0_i32_2 = arith.constant 0 : i32
    return %c0_i32, %c0_i32_0, %c0_i32_1 : i32, i32, i32
  }
  func.func @transform_6(%arg0: i32) -> (i32, i32, i32) {
    %c0_i32 = arith.constant 0 : i32
    %c0_i32_0 = arith.constant 0 : i32
    %c0_i32_1 = arith.constant 0 : i32
    %c0_i32_2 = arith.constant 0 : i32
    return %c0_i32, %c0_i32_0, %c0_i32_1 : i32, i32, i32
  }
  func.func @transform_7(%arg0: i32) -> (i32, i32) {
    %c0_i32 = arith.constant 0 : i32
    %c0_i32_0 = arith.constant 0 : i32
    %c0_i32_1 = arith.constant 0 : i32
    return %c0_i32, %c0_i32_0 : i32, i32
  }
}

</mosaic_0001>

<bundles_post_ra>
// kernel: lstm_model_forward.1
= control target key start
LH: loop header
LB: loop body
LE: loop exit
PB: predicated region body
PF: predicated region fallthrough
CT: control target
= control target key end

     0   :  { %vm37_vm0 = vcmask 130048   ;;  %v3010_v12 = vmov 0.0   ;;  %vm3011_vm1 = vmmov 0   ;;  %v3012_v16 = vmov 0   ;;  %s3013_s22 = smov 64   ;;  %s3014_s23 = smov 32   ;;  %s3637_s1 = inlined_call_operand.vmem [shape: f32[2,16,128], index: 1, kind: input, shape index: {}]   ;;  %s3638_s0 = inlined_call_operand.vmem [shape: f32[32,16], index: 0, kind: input, shape index: {}]   ;;  %s3639_s2 = inlined_call_operand.vmem [shape: f32[2,32,128], index: 2, kind: input, shape index: {}]   ;;  %s3640_s3 = inlined_call_operand.vmem [shape: f32[2,1,128], index: 3, kind: input, shape index: {}]   ;;  %s3641_s4 = inlined_call_operand.vmem [shape: f32[2,64,128], index: 4, kind: input, shape index: {}]   ;;  %s3642_s5 = inlined_call_operand.vmem [shape: f32[2,32,128], index: 5, kind: input, shape index: {}]   ;;  %s3643_s6 = inlined_call_operand.vmem [shape: f32[2,1,128], index: 6, kind: input, shape index: {}]   ;;  %s3644_s7 = inlined_call_operand.vmem [shape: f32[4,64], index: 7, kind: output, shape index: {}]  }
   0x1   :  { %v34_v0 = vld [vmem:[%s3637_s1] sm:$0xff]  ;;  %v35_v1 = vld [vmem:[%s3637_s1 + $0x8] sm:$0xff]  ;;  %v29_v5 = vld [vmem:[%s3638_s0 + $0x10] sm:$0xff]  ;;  %vm181_vm2 = vcmask 261120   ;;  %vm790_vm3 = vcmask 1043456   ;;  %vm2368_vm4 = vcmask 523268  }
   0x2   :  { %v27_v2 = vld [vmem:[%s3638_s0] sm:$0xff]  ;;  %v36_v3 = vpack.c.bf16 %v35_v1, %v34_v0  ;;  %v28_v4 = vld [vmem:[%s3638_s0 + $0x8] sm:$0xff]  ;;  %v30_v6 = vld [vmem:[%s3638_s0 + $0x18] sm:$0xff] }
   0x3   :  { %v31_v7 = vpack.c.bf16 %v28_v4, %v27_v2  ;;  %v168_v8 = vld [vmem:[%s3639_s2] sm:$0xff]  ;;  %v169_v9 = vld [vmem:[%s3639_s2 + $0x8] sm:$0xff]  ;;  %v3079_v10 = vpack.c.bf16 %v30_v6, %v29_v5  ;;  %v170_v13 = vld [vmem:[%s3639_s2 + $0x10] sm:$0xff] }
   0x4   :  { %2553 = vmatprep.subr.bf16.mxu0 %v36_v3  ;;  %v3082_v11 = vpack.c.bf16 %v169_v9, %v168_v8  ;;  %v171_v14 = vld [vmem:[%s3639_s2 + $0x18] sm:$0xff]  ;;  %v2376_v17 = vld [vmem:[%s3640_s3] ss:$0 sm:$0xff]  ;;  %v2378_v41 = vld [vmem:[%s3637_s1 + $0x10] sm:$0xff] }
   0x5   :  { %2554 = vmatpush3.bf16.msra.mxu0 %v36_v3  ;;  %2555 = vmatprep.mubr.msk.bf16.mxu0 %vm37_vm0, %v31_v7  ;;  %v3095_v15 = vpack.c.bf16 %v171_v14, %v170_v13  ;;  %v2379_v42 = vld [vmem:[%s3637_s1 + $0x18] sm:$0xff]  ;;  %v3144_v48 = vld [vmem:[%s3640_s3 + $0x1] ss:$0 sm:$0xff] }
   0x6   :  { %2565 = vmatprep.subr.bf16.mxu0 %v3010_v12  ;;  %2561 = vmatprep.mubr.msk.bf16.mxu1 %vm37_vm0, %v31_v7  ;;  %v108_v43 = vpack.c.bf16 %v2379_v42, %v2378_v41 }
   0x8   :  { %2556 = vmatmul.mubr.msk.bf16.vlgmr.msra.gmra.mrb[0].mxu0 %vm37_vm0, %v3079_v10  ;;  %2559 = vmatprep.subr.bf16.mxu1 %v108_v43 }
   0x9   :  { %2566 = vmatpush3.bf16.msra.mxu0 %v3082_v11  ;;  %2569 = vmatprep.mubr.msk.bf16.mxu0 %vm3011_vm1, %v3010_v12 }
   0xa   :  { %2567 = vmatprep.subr.bf16.mxu0 %v3010_v12  ;;  %2560 = vmatpush3.bf16.msra.mxu1 %v108_v43 }
   0xb   :  { %2573 = vmatprep.subr.bf16.mxu1 %v3010_v12 }
   0xd   :  { %2568 = vmatpush3.bf16.msra.mxu0 %v3095_v15  ;;  %2562 = vmatmul.mubr.msk.bf16.vlgmr.msra.gmra.mrb[0].mxu1 %vm37_vm0, %v3079_v10 }
   0xe   :  { %2581 = vmatprep.subr.bf16.mxu0 %v3010_v12  ;;  %2574 = vmatpush3.bf16.msra.mxu1 %v3082_v11 }
   0xf   :  { %2577 = vmatprep.mubr.msk.bf16.mxu1 %vm3011_vm1, %v3010_v12  ;;  %2575 = vmatprep.subr.bf16.mxu1 %v3010_v12 }
  0x10   :  { %2570 = vmatmul.mubr.bf16.vlgmr.msra.gmra.mrb[4].mxu0 %v3012_v16 }
  0x11   :  { %2582 = vmatpush3.bf16.msra.mxu0 %v3082_v11  ;;  %2585 = vmatprep.mubr.msk.bf16.mxu0 %vm3011_vm1, %v3010_v12 }
  0x12   :  { %2583 = vmatprep.subr.bf16.mxu0 %v3010_v12  ;;  %2576 = vmatpush3.bf16.msra.mxu1 %v3095_v15 }
  0x13   :  { %2589 = vmatprep.subr.bf16.mxu1 %v3010_v12 }
  0x15   :  { %2584 = vmatpush3.bf16.msra.mxu0 %v3095_v15 }
  0x16   :  { %2597 = vmatprep.subr.bf16.mxu0 %v3010_v12 }
  0xdb   :  { %v2557_v18 = vpop.f32.mrb[0].mxu0 }
  0xdc   :  { %v3112_v19 = vadd.f32 %v2557_v18, %v2376_v17  ;;  %v78_v20 = vpop.f32.mrb[1].mxu0 }
  0xdd   :  { %v2558_v21 = vpop.f32.mrb[2].mxu0  ;;  %v99_v25 = vadd.f32 %v2376_v17, %v78_v20 }
  0xde   :  { %v3114_v22 = vadd.f32 %v2558_v21, %v2376_v17  ;;  %v81_v23 = vpop.f32.mrb[3].mxu0 }
  0xdf   :  { %v3116_v24 = vadd.f32 %v2376_v17, %v81_v23 }
  0xe0   :  { %v2563_v49 = vpop.f32.mrb[0].mxu1 }
  0xe1   :  { %v3147_v50 = vadd.f32 %v2563_v49, %v3144_v48  ;;  %v143_v51 = vpop.f32.mrb[1].mxu1 }
  0xe2   :  { %v3150_v52 = vadd.f32 %v3144_v48, %v143_v51  ;;  %v3152_v53 = vpop.f32.mrb[2].mxu1 }
  0xe3   :  { %v219_v26 = vpop.f32.mrb[4].mxu0  ;;  %v146_v54 = vpop.f32.mrb[3].mxu1 }
  0xe4   :  { %v225_v27 = vadd.f32 %v219_v26, %v99_v25  ;;  %v2571_v28 = vpop.f32.mrb[5].mxu0  ;;  %v3155_v55 = vadd.f32 %v3144_v48, %v146_v54 }
  0xe5   :  { %v222_v29 = vpop.f32.mrb[6].mxu0 }
  0xe6   :  { %2810 = vtanh.f32 %v225_v27  ;;  %v2572_v30 = vpop.f32.mrb[7].mxu0  ;;  %v2387_v32 = vmul.f32 -1.442695, %v225_v27 }
  0xe8   :  { %2812 = vpow2.f32 %v2387_v32 }
  0xf0   :  { %v2811_v31 = vpop.eup %2810 }
  0xf1   :  { %235 = vrot.lane.b32.xlu0 %v2811_v31, %s3013_s22 }
  0xf2   :  { %v2813_v33 = vpop.eup %2812 }
  0xf3   :  { %v229_v34 = vadd.f32 1.0, %v2813_v33 }
  0xf5   :  { %2814 = vrcp.f32 %v229_v34 }
  0xff   :  { %v2815_v35 = vpop.eup %2814 }
 0x100   :  { %v233_v38 = vmul.f32 0.0, %v2815_v35 }
 0x163   :  { %v236_v36 = vpop.permute.xlu0 %235 }
 0x164   :  { %v238_v37 = vmul.f32 %v2815_v35, %v236_v36 }
 0x166   :  { %240 = vrot.lane.b32.xlu0 %v238_v37, %s3014_s23 }
 0x1d8   :  { %v241_v39 = vpop.permute.xlu0 %240 }
 0x1d9   :  { %v243_v40 = vadd.f32 %v241_v39, %v233_v38 }
 0x1db   :  { %2816 = vtanh.f32 %v243_v40  ;;  %v309_v6 = vrot.slane %v243_v40, 4 }
 0x1e5   :  { %v2817_v44 = vpop.eup %2816 }
 0x1e6   :  { %246 = vrot.lane.b32.xlu1 %v2817_v44, %s3013_s22 }
 0x258   :  { %v247_v45 = vpop.permute.xlu1 %246 }
 0x259   :  { %v3136_v46 = vmul.f32 %v2815_v35, %v247_v45 }
 0x25b   :  { %v250_v47 = vpack.c.bf16 %v3136_v46, %v3136_v46 }
 0x25d   :  { %252 = vrot.lane.b32.xlu1 %v250_v47, %s3014_s23 }
 0x2cf   :  { %v253_v56 = vpop.permute.xlu1 %252 }
 0x2d0   :  { %2578 = vmatmul.mubr.msk.bf16.vlgmr.msra.gmra.mrb[4].mxu1 %vm181_vm2, %v253_v56 }
 0x2d1   :  { %2590 = vmatpush3.bf16.msra.mxu1 %v3082_v11  ;;  %2593 = vmatprep.mubr.msk.bf16.mxu1 %vm3011_vm1, %v3010_v12 }
 0x2d2   :  { %2591 = vmatprep.subr.bf16.mxu1 %v3010_v12 }
 0x2d5   :  { %2592 = vmatpush3.bf16.msra.mxu1 %v3095_v15 }
 0x2d6   :  { %2605 = vmatprep.subr.bf16.mxu1 %v3010_v12 }
 0x3a3   :  { %v291_v57 = vpop.f32.mrb[4].mxu1 }
 0x3a4   :  { %v298_v58 = vrot.slane %v291_v57, 4  ;;  %v2579_v59 = vpop.f32.mrb[5].mxu1 }
 0x3a5   :  { %v294_v60 = vpop.f32.mrb[6].mxu1 }
 0x3a6   :  { %v300_v61 = vadd.f32 %v298_v58, %v99_v25  ;;  %v2580_v62 = vpop.f32.mrb[7].mxu1 }
 0x3a8   :  { %2818 = vtanh.f32 %v300_v61  ;;  %v2389_v0 = vmul.f32 -1.442695, %v300_v61 }
 0x3aa   :  { %2820 = vpow2.f32 %v2389_v0 }
 0x3b2   :  { %v2819_v63 = vpop.eup %2818 }
 0x3b3   :  { %313 = vrot.lane.b32.xlu0 %v2819_v63, %s3013_s22 }
 0x3b4   :  { %v2821_v1 = vpop.eup %2820 }
 0x3b5   :  { %v304_v2 = vadd.f32 1.0, %v2821_v1 }
 0x3b7   :  { %2822 = vrcp.f32 %v304_v2 }
 0x3c1   :  { %v2823_v3 = vpop.eup %2822 }
 0x3c2   :  { %v311_v7 = vmul.f32 %v2823_v3, %v309_v6 }
 0x425   :  { %v314_v4 = vpop.permute.xlu0 %313 }
 0x426   :  { %v316_v5 = vmul.f32 %v2823_v3, %v314_v4 }
 0x428   :  { %318 = vrot.lane.b32.xlu1 %v316_v5, %s3014_s23 }
 0x49a   :  { %v319_v8 = vpop.permute.xlu1 %318 }
 0x49b   :  { %v321_v9 = vadd.f32 %v319_v8, %v311_v7 }
 0x49d   :  { %2824 = vtanh.f32 %v321_v9  ;;  %v385_v35 = vrot.slane %v321_v9, 4 }
 0x4a7   :  { %v2825_v10 = vpop.eup %2824 }
 0x4a8   :  { %324 = vrot.lane.b32.xlu0 %v2825_v10, %s3013_s22 }
 0x51a   :  { %v325_v13 = vpop.permute.xlu0 %324 }
 0x51b   :  { %v3167_v14 = vmul.f32 %v2823_v3, %v325_v13 }
 0x51d   :  { %v328_v17 = vpack.c.bf16 %v3167_v14, %v3167_v14  ;;  %v3198_v6 = vsel %vm790_vm3, %v3136_v46, %v3167_v14 }
 0x51f   :  { %v330_v18 = vrot.slane %v328_v17, 2 }
 0x521   :  { %331 = vrot.lane.b32.xlu1 %v330_v18, %s3014_s23 }
 0x593   :  { %v332_v20 = vpop.permute.xlu1 %331 }
 0x594   :  { %2586 = vmatmul.mubr.msk.bf16.vlgmr.msra.gmra.mrb[8].mxu0 %vm181_vm2, %v332_v20 }
 0x595   :  { %2598 = vmatpush3.bf16.msra.mxu0 %v3082_v11  ;;  %2601 = vmatprep.mubr.msk.bf16.mxu0 %vm3011_vm1, %v3010_v12 }
 0x596   :  { %2599 = vmatprep.subr.bf16.mxu0 %v3010_v12 }
 0x599   :  { %2600 = vmatpush3.bf16.msra.mxu0 %v3095_v15 }
 0x59a   :  { %2613 = vmatprep.subr.bf16.mxu0 %v3010_v12 }
 0x667   :  { %v370_v21 = vpop.f32.mrb[8].mxu0 }
 0x668   :  { %v376_v23 = vadd.f32 %v370_v21, %v3116_v24  ;;  %v2587_v25 = vpop.f32.mrb[9].mxu0 }
 0x669   :  { %v373_v26 = vpop.f32.mrb[10].mxu0 }
 0x66a   :  { %2826 = vtanh.f32 %v376_v23  ;;  %v2588_v27 = vpop.f32.mrb[11].mxu0  ;;  %v2391_v29 = vmul.f32 -1.442695, %v376_v23 }
 0x66c   :  { %2828 = vpow2.f32 %v2391_v29 }
 0x674   :  { %v2827_v28 = vpop.eup %2826 }
 0x675   :  { %389 = vrot.lane.b32.xlu0 %v2827_v28, %s3013_s22 }
 0x676   :  { %v2829_v30 = vpop.eup %2828 }
 0x677   :  { %v380_v31 = vadd.f32 1.0, %v2829_v30 }
 0x679   :  { %2830 = vrcp.f32 %v380_v31 }
 0x683   :  { %v2831_v32 = vpop.eup %2830 }
 0x684   :  { %v387_v36 = vmul.f32 %v2831_v32, %v385_v35 }
 0x6e7   :  { %v390_v33 = vpop.permute.xlu0 %389 }
 0x6e8   :  { %v392_v34 = vmul.f32 %v2831_v32, %v390_v33 }
 0x6ea   :  { %394 = vrot.lane.b32.xlu1 %v392_v34, %s3014_s23 }
 0x75c   :  { %v395_v37 = vpop.permute.xlu1 %394 }
 0x75d   :  { %v397_v38 = vadd.f32 %v395_v37, %v387_v36 }
 0x75f   :  { %2832 = vtanh.f32 %v397_v38  ;;  %v463_v63 = vrot.slane %v397_v38, 4 }
 0x769   :  { %v2833_v39 = vpop.eup %2832 }
 0x76a   :  { %400 = vrot.lane.b32.xlu0 %v2833_v39, %s3013_s22 }
 0x7dc   :  { %v401_v40 = vpop.permute.xlu0 %400 }
 0x7dd   :  { %v403_v41 = vmul.f32 %v2831_v32, %v401_v40 }
 0x7df   :  { %v404_v42 = vpack.c.bf16 %v403_v41, %v403_v41 }
 0x7e1   :  { %406 = vrot.lane.b32.xlu1 %v404_v42, %s3014_s23 }
 0x853   :  { %v407_v43 = vpop.permute.xlu1 %406 }
 0x854   :  { %2594 = vmatmul.mubr.msk.bf16.vlgmr.msra.gmra.mrb[8].mxu1 %vm181_vm2, %v407_v43 }
 0x855   :  { %2606 = vmatpush3.bf16.msra.mxu1 %v3082_v11  ;;  %2609 = vmatprep.mubr.msk.bf16.mxu1 %vm3011_vm1, %v3010_v12 }
 0x856   :  { %2607 = vmatprep.subr.bf16.mxu1 %v3010_v12 }
 0x859   :  { %2608 = vmatpush3.bf16.msra.mxu1 %v3095_v15 }
 0x85a   :  { %2621 = vmatprep.subr.bf16.mxu1 %v3010_v12 }
 0x927   :  { %v445_v44 = vpop.f32.mrb[8].mxu1 }
 0x928   :  { %v452_v45 = vrot.slane %v445_v44, 4  ;;  %v2595_v47 = vpop.f32.mrb[9].mxu1 }
 0x929   :  { %v448_v49 = vpop.f32.mrb[10].mxu1 }
 0x92a   :  { %v454_v51 = vadd.f32 %v452_v45, %v3116_v24  ;;  %v2596_v54 = vpop.f32.mrb[11].mxu1 }
 0x92c   :  { %2834 = vtanh.f32 %v454_v51  ;;  %v2393_v57 = vmul.f32 -1.442695, %v454_v51 }
 0x92e   :  { %2836 = vpow2.f32 %v2393_v57 }
 0x936   :  { %v2835_v56 = vpop.eup %2834 }
 0x937   :  { %467 = vrot.lane.b32.xlu0 %v2835_v56, %s3013_s22 }
 0x938   :  { %v2837_v58 = vpop.eup %2836 }
 0x939   :  { %v458_v59 = vadd.f32 1.0, %v2837_v58 }
 0x93b   :  { %2838 = vrcp.f32 %v458_v59 }
 0x945   :  { %v2839_v60 = vpop.eup %2838 }
 0x946   :  { %v465_v0 = vmul.f32 %v2839_v60, %v463_v63  ;;  %v2383_v63 = vld [vmem:[%s3639_s2 + $0x20] sm:$0xff] }
 0x9a9   :  { %v468_v61 = vpop.permute.xlu0 %467 }
 0x9aa   :  { %v470_v62 = vmul.f32 %v2839_v60, %v468_v61 }
 0x9ac   :  { %472 = vrot.lane.b32.xlu1 %v470_v62, %s3014_s23 }
 0xa1e   :  { %v473_v1 = vpop.permute.xlu1 %472 }
 0xa1f   :  { %v475_v2 = vadd.f32 %v473_v1, %v465_v0  ;;  %v2384_v0 = vld [vmem:[%s3639_s2 + $0x28] sm:$0xff] }
 0xa20   :  { %v3247_v1 = vpack.c.bf16 %v2384_v0, %v2383_v63 }
 0xa21   :  { %2840 = vtanh.f32 %v475_v2  ;;  %v539_v29 = vrot.slane %v475_v2, 4  ;;  %v2385_v2 = vld [vmem:[%s3639_s2 + $0x30] sm:$0xff] }
 0xa2b   :  { %v2841_v24 = vpop.eup %2840 }
 0xa2c   :  { %478 = vrot.lane.b32.xlu0 %v2841_v24, %s3013_s22  ;;  %v2386_v24 = vld [vmem:[%s3639_s2 + $0x38] sm:$0xff] }
 0xa9e   :  { %v479_v3 = vpop.permute.xlu0 %478 }
 0xa9f   :  { %v481_v4 = vmul.f32 %v2839_v60, %v479_v3 }
 0xaa1   :  { %v482_v5 = vpack.c.bf16 %v481_v4, %v481_v4  ;;  %v3201_v7 = vsel %vm790_vm3, %v403_v41, %v481_v4  ;;  %v3257_v4 = vpack.c.bf16 %v2386_v24, %v2385_v2 }
 0xaa2   :  { %v795_v8 = vpack.c.bf16 %v3201_v7, %v3198_v6 }
 0xaa3   :  { %v484_v9 = vrot.slane %v482_v5, 2 }
 0xaa5   :  { %485 = vrot.lane.b32.xlu1 %v484_v9, %s3014_s23 }
 0xb17   :  { %v486_v10 = vpop.permute.xlu1 %485 }
 0xb18   :  { %2602 = vmatmul.mubr.msk.bf16.vlgmr.msra.gmra.mrb[12].mxu0 %vm181_vm2, %v486_v10 }
 0xb19   :  { %2614 = vmatpush3.bf16.msra.mxu0 %v3082_v11  ;;  %2617 = vmatprep.mubr.msk.bf16.mxu0 %vm3011_vm1, %v3010_v12 }
 0xb1a   :  { %2615 = vmatprep.subr.bf16.mxu0 %v3010_v12 }
 0xb1d   :  { %2616 = vmatpush3.bf16.msra.mxu0 %v3095_v15 }
 0xb1e   :  { %2629 = vmatprep.subr.bf16.mxu0 %v3010_v12 }
 0xbeb   :  { %v524_v46 = vpop.f32.mrb[12].mxu0 }
 0xbec   :  { %v530_v13 = vadd.f32 %v524_v46, %v3112_v19  ;;  %v2603_v14 = vpop.f32.mrb[13].mxu0 }
 0xbed   :  { %v527_v17 = vpop.f32.mrb[14].mxu0 }
 0xbee   :  { %2842 = vtanh.f32 %v530_v13  ;;  %v2604_v18 = vpop.f32.mrb[15].mxu0  ;;  %v2395_v21 = vmul.f32 -1.442695, %v530_v13  ;;  %v3274_v17 = vadd.f32 %v3152_v53, %v3144_v48 }
 0xbf0   :  { %2844 = vpow2.f32 %v2395_v21 }
 0xbf8   :  { %v2843_v20 = vpop.eup %2842 }
 0xbf9   :  { %543 = vrot.lane.b32.xlu0 %v2843_v20, %s3013_s22 }
 0xbfa   :  { %v2845_v23 = vpop.eup %2844 }
 0xbfb   :  { %v534_v25 = vadd.f32 1.0, %v2845_v23 }
 0xbfd   :  { %2846 = vrcp.f32 %v534_v25 }
 0xc07   :  { %v2847_v26 = vpop.eup %2846 }
 0xc08   :  { %v541_v30 = vmul.f32 %v2847_v26, %v539_v29 }
 0xc6b   :  { %v544_v27 = vpop.permute.xlu0 %543 }
 0xc6c   :  { %v546_v28 = vmul.f32 %v2847_v26, %v544_v27 }
 0xc6e   :  { %548 = vrot.lane.b32.xlu1 %v546_v28, %s3014_s23 }
 0xce0   :  { %v549_v31 = vpop.permute.xlu1 %548 }
 0xce1   :  { %v551_v32 = vadd.f32 %v549_v31, %v541_v30 }
 0xce3   :  { %2848 = vtanh.f32 %v551_v32  ;;  %v617_v54 = vrot.slane %v551_v32, 4 }
 0xced   :  { %v2849_v33 = vpop.eup %2848 }
 0xcee   :  { %554 = vrot.lane.b32.xlu0 %v2849_v33, %s3013_s22 }
 0xd60   :  { %v555_v34 = vpop.permute.xlu0 %554 }
 0xd61   :  { %v3217_v35 = vmul.f32 %v2847_v26, %v555_v34 }
 0xd63   :  { %v558_v36 = vpack.c.bf16 %v3217_v35, %v3217_v35 }
 0xd65   :  { %560 = vrot.lane.b32.xlu1 %v558_v36, %s3014_s23 }
 0xdd7   :  { %v561_v37 = vpop.permute.xlu1 %560 }
 0xdd8   :  { %2610 = vmatmul.mubr.msk.bf16.vlgmr.msra.gmra.mrb[12].mxu1 %vm181_vm2, %v561_v37 }
 0xdd9   :  { %2622 = vmatpush3.bf16.msra.mxu1 %v3082_v11  ;;  %2625 = vmatprep.mubr.msk.bf16.mxu1 %vm3011_vm1, %v3010_v12 }
 0xdda   :  { %2623 = vmatprep.subr.bf16.mxu1 %v3010_v12 }
 0xddd   :  { %2624 = vmatpush3.bf16.msra.mxu1 %v3095_v15 }
 0xdde   :  { %2637 = vmatprep.subr.bf16.mxu1 %v3010_v12 }
 0xeab   :  { %v599_v38 = vpop.f32.mrb[12].mxu1 }
 0xeac   :  { %v606_v39 = vrot.slane %v599_v38, 4  ;;  %v2611_v40 = vpop.f32.mrb[13].mxu1 }
 0xead   :  { %v602_v41 = vpop.f32.mrb[14].mxu1 }
 0xeae   :  { %v608_v42 = vadd.f32 %v606_v39, %v3112_v19  ;;  %v2612_v43 = vpop.f32.mrb[15].mxu1 }
 0xeb0   :  { %2850 = vtanh.f32 %v608_v42  ;;  %v2397_v11 = vmul.f32 -1.442695, %v608_v42 }
 0xeb2   :  { %2852 = vpow2.f32 %v2397_v11 }
 0xeba   :  { %v2851_v44 = vpop.eup %2850 }
 0xebb   :  { %621 = vrot.lane.b32.xlu0 %v2851_v44, %s3013_s22 }
 0xebc   :  { %v2853_v45 = vpop.eup %2852 }
 0xebd   :  { %v612_v47 = vadd.f32 1.0, %v2853_v45 }
 0xebf   :  { %2854 = vrcp.f32 %v612_v47 }
 0xec9   :  { %v2855_v49 = vpop.eup %2854 }
 0xeca   :  { %v619_v56 = vmul.f32 %v2855_v49, %v617_v54 }
 0xf2d   :  { %v622_v15 = vpop.permute.xlu0 %621 }
 0xf2e   :  { %v624_v51 = vmul.f32 %v2855_v49, %v622_v15 }
 0xf30   :  { %626 = vrot.lane.b32.xlu1 %v624_v51, %s3014_s23 }
 0xfa2   :  { %v627_v57 = vpop.permute.xlu1 %626 }
 0xfa3   :  { %v3232_v58 = vadd.f32 %v627_v57, %v619_v56 }
 0xfa5   :  { %2856 = vtanh.f32 %v3232_v58  ;;  %v693_v39 = vrot.slane %v3232_v58, 4 }
 0xfaf   :  { %v2857_v19 = vpop.eup %2856 }
 0xfb0   :  { %632 = vrot.lane.b32.xlu0 %v2857_v19, %s3013_s22 }
0x1022   :  { %v633_v59 = vpop.permute.xlu0 %632 }
0x1023   :  { %v3236_v60 = vmul.f32 %v2855_v49, %v633_v59 }
0x1025   :  { %v636_v61 = vpack.c.bf16 %v3236_v60, %v3236_v60 }
0x1027   :  { %v638_v62 = vrot.slane %v636_v61, 2 }
0x1029   :  { %639 = vrot.lane.b32.xlu1 %v638_v62, %s3014_s23 }
0x109b   :  { %v640_v3 = vpop.permute.xlu1 %639 }
0x109c   :  { %2618 = vmatmul.mubr.msk.bf16.vlgmr.msra.gmra.mrb[16].mxu0 %vm181_vm2, %v640_v3 }
0x109d   :  { %2630 = vmatpush3.bf16.msra.mxu0 %v3247_v1  ;;  %2633 = vmatprep.mubr.msk.bf16.mxu0 %vm3011_vm1, %v3010_v12 }
0x109e   :  { %2631 = vmatprep.subr.bf16.mxu0 %v3010_v12 }
0x10a1   :  { %2632 = vmatpush3.bf16.msra.mxu0 %v3257_v4 }
0x10a2   :  { %2645 = vmatprep.subr.bf16.mxu0 %v3010_v12 }
0x10a4   :  { %2634 = vmatmul.mubr.bf16.vlgmr.msra.gmra.mrb[20].mxu0 %v3012_v16 }
0x10a5   :  { %2646 = vmatpush3.bf16.msra.mxu0 %v3247_v1  ;;  %2649 = vmatprep.mubr.msk.bf16.mxu0 %vm3011_vm1, %v3010_v12 }
0x10a6   :  { %2647 = vmatprep.subr.bf16.mxu0 %v3010_v12 }
0x10a9   :  { %2648 = vmatpush3.bf16.msra.mxu0 %v3257_v4 }
0x10aa   :  { %2661 = vmatprep.subr.bf16.mxu0 %v3010_v12 }
0x116f   :  { %v678_v5 = vpop.f32.mrb[16].mxu0 }
0x1170   :  { %v684_v9 = vadd.f32 %v678_v5, %v3114_v22  ;;  %v2619_v10 = vpop.f32.mrb[17].mxu0 }
0x1171   :  { %v681_v46 = vpop.f32.mrb[18].mxu0 }
0x1172   :  { %2858 = vtanh.f32 %v684_v9  ;;  %v2620_v13 = vpop.f32.mrb[19].mxu0  ;;  %v2399_v28 = vmul.f32 -1.442695, %v684_v9 }
0x1177   :  { %v831_v14 = vpop.f32.mrb[20].mxu0 }
0x1178   :  { %v838_v18 = vrot.slane %v831_v14, 4  ;;  %v2635_v20 = vpop.f32.mrb[21].mxu0 }
0x1179   :  { %v834_v21 = vpop.f32.mrb[22].mxu0 }
0x117a   :  { %v840_v23 = vadd.f32 %v838_v18, %v3274_v17  ;;  %v2636_v25 = vpop.f32.mrb[23].mxu0 }
0x117c   :  { %v2859_v26 = vpop.eup %2858  ;;  %2860 = vtanh.f32 %v840_v23  ;;  %v2402_v29 = vmul.f32 -1.442695, %v840_v23 }
0x117d   :  { %697 = vrot.lane.b32.xlu0 %v2859_v26, %s3013_s22  ;;  %2862 = vpow2.f32 %v2399_v28 }
0x117e   :  { %2864 = vpow2.f32 %v2402_v29 }
0x1186   :  { %v2861_v27 = vpop.eup %2860 }
0x1187   :  { %850 = vrot.lane.b32.xlu1 %v2861_v27, %s3013_s22  ;;  %v2863_v30 = vpop.eup %2862 }
0x1188   :  { %v688_v48 = vadd.f32 1.0, %v2863_v30  ;;  %v2865_v53 = vpop.eup %2864 }
0x1189   :  { %v844_v31 = vadd.f32 1.0, %v2865_v53 }
0x118a   :  { %2866 = vrcp.f32 %v688_v48 }
0x118b   :  { %2868 = vrcp.f32 %v844_v31 }
0x1194   :  { %v2867_v32 = vpop.eup %2866 }
0x1195   :  { %v2869_v36 = vpop.eup %2868  ;;  %v695_v40 = vmul.f32 %v2867_v32, %v693_v39 }
0x1196   :  { %v848_v43 = vmul.f32 0.0, %v2869_v36 }
0x11ef   :  { %v698_v33 = vpop.permute.xlu0 %697 }
0x11f0   :  { %v700_v34 = vmul.f32 %v2867_v32, %v698_v33 }
0x11f2   :  { %702 = vrot.lane.b32.xlu0 %v700_v34, %s3014_s23 }
0x11f9   :  { %v851_v37 = vpop.permute.xlu1 %850 }
0x11fa   :  { %v853_v38 = vmul.f32 %v2869_v36, %v851_v37 }
0x11fc   :  { %855 = vrot.lane.b32.xlu1 %v853_v38, %s3014_s23 }
0x1264   :  { %v703_v41 = vpop.permute.xlu0 %702 }
0x1265   :  { %v3282_v42 = vadd.f32 %v703_v41, %v695_v40 }
0x1267   :  { %2870 = vtanh.f32 %v3282_v42 }
0x126e   :  { %v856_v44 = vpop.permute.xlu1 %855 }
0x126f   :  { %v858_v11 = vadd.f32 %v856_v44, %v848_v43 }
0x1271   :  { %v2871_v45 = vpop.eup %2870  ;;  %2872 = vtanh.f32 %v858_v11  ;;  %v922_v23 = vrot.slane %v858_v11, 4 }
0x1272   :  { %708 = vrot.lane.b32.xlu0 %v2871_v45, %s3013_s22 }
0x127b   :  { %v2873_v47 = vpop.eup %2872 }
0x127c   :  { %861 = vrot.lane.b32.xlu1 %v2873_v47, %s3013_s22 }
0x12e4   :  { %v709_v49 = vpop.permute.xlu0 %708 }
0x12e5   :  { %v3287_v15 = vmul.f32 %v2867_v32, %v709_v49 }
0x12e7   :  { %v712_v51 = vpack.c.bf16 %v3287_v15, %v3287_v15 }
0x12e9   :  { %714 = vrot.lane.b32.xlu0 %v712_v51, %s3014_s23 }
0x12ee   :  { %v862_v54 = vpop.permute.xlu1 %861 }
0x12ef   :  { %v3292_v56 = vmul.f32 %v2869_v36, %v862_v54 }
0x12f1   :  { %v865_v57 = vpack.c.bf16 %v3292_v56, %v3292_v56 }
0x12f3   :  { %v867_v58 = vrot.slane %v865_v57, 2 }
0x12f5   :  { %868 = vrot.lane.b32.xlu1 %v867_v58, %s3014_s23 }
0x135b   :  { %v715_v19 = vpop.permute.xlu0 %714 }
0x135c   :  { %2626 = vmatmul.mubr.msk.bf16.vlgmr.msra.gmra.mrb[16].mxu1 %vm181_vm2, %v715_v19 }
0x135d   :  { %2638 = vmatpush3.bf16.msra.mxu1 %v3247_v1  ;;  %2641 = vmatprep.mubr.msk.bf16.mxu1 %vm3011_vm1, %v3010_v12 }
0x135e   :  { %2639 = vmatprep.subr.bf16.mxu1 %v3010_v12 }
0x1361   :  { %2640 = vmatpush3.bf16.msra.mxu1 %v3257_v4 }
0x1362   :  { %2653 = vmatprep.subr.bf16.mxu1 %v3010_v12 }
0x1367   :  { %v869_v59 = vpop.permute.xlu1 %868 }
0x1368   :  { %2642 = vmatmul.mubr.msk.bf16.vlgmr.msra.gmra.mrb[20].mxu1 %vm181_vm2, %v869_v59 }
0x1369   :  { %2654 = vmatpush3.bf16.msra.mxu1 %v3247_v1  ;;  %2657 = vmatprep.mubr.msk.bf16.mxu1 %vm3011_vm1, %v3010_v12 }
0x136a   :  { %2655 = vmatprep.subr.bf16.mxu1 %v3010_v12 }
0x136d   :  { %2656 = vmatpush3.bf16.msra.mxu1 %v3257_v4 }
0x136e   :  { %2669 = vmatprep.subr.bf16.mxu1 %v3010_v12 }
0x142f   :  { %v3311_v61 = vpop.f32.mrb[16].mxu1 }
0x1430   :  { %v2627_v62 = vpop.f32.mrb[17].mxu1 }
0x1431   :  { %v756_v63 = vpop.f32.mrb[18].mxu1 }
0x1432   :  { %v2628_v0 = vpop.f32.mrb[19].mxu1 }
0x143b   :  { %v907_v2 = vpop.f32.mrb[20].mxu1 }
0x143c   :  { %v913_v24 = vadd.f32 %v907_v2, %v3274_v17  ;;  %v2643_v3 = vpop.f32.mrb[21].mxu1 }
0x143d   :  { %v910_v5 = vpop.f32.mrb[22].mxu1 }
0x143e   :  { %2874 = vtanh.f32 %v913_v24  ;;  %v2644_v9 = vpop.f32.mrb[23].mxu1  ;;  %v2404_v46 = vmul.f32 -1.442695, %v913_v24 }
0x1440   :  { %2876 = vpow2.f32 %v2404_v46 }
0x1448   :  { %v2875_v10 = vpop.eup %2874 }
0x1449   :  { %926 = vrot.lane.b32.xlu0 %v2875_v10, %s3013_s22 }
0x144a   :  { %v2877_v13 = vpop.eup %2876 }
0x144b   :  { %v917_v14 = vadd.f32 1.0, %v2877_v13 }
0x144d   :  { %2878 = vrcp.f32 %v917_v14 }
0x1457   :  { %v2879_v18 = vpop.eup %2878 }
0x1458   :  { %v924_v25 = vmul.f32 %v2879_v18, %v922_v23 }
0x14bb   :  { %v927_v20 = vpop.permute.xlu0 %926 }
0x14bc   :  { %v929_v21 = vmul.f32 %v2879_v18, %v927_v20 }
0x14be   :  { %931 = vrot.lane.b32.xlu1 %v929_v21, %s3014_s23 }
0x1530   :  { %v932_v17 = vpop.permute.xlu1 %931 }
0x1531   :  { %v934_v26 = vadd.f32 %v932_v17, %v924_v25 }
0x1533   :  { %2880 = vtanh.f32 %v934_v26  ;;  %v1000_v11 = vrot.slane %v934_v26, 4 }
0x153d   :  { %v2881_v27 = vpop.eup %2880 }
0x153e   :  { %937 = vrot.lane.b32.xlu0 %v2881_v27, %s3013_s22 }
0x15b0   :  { %v938_v28 = vpop.permute.xlu0 %937 }
0x15b1   :  { %v3317_v29 = vmul.f32 %v2879_v18, %v938_v28 }
0x15b3   :  { %v941_v30 = vpack.c.bf16 %v3317_v29, %v3317_v29  ;;  %v3351_v28 = vsel %vm790_vm3, %v3317_v29, %v3292_v56 }
0x15b5   :  { %943 = vrot.lane.b32.xlu1 %v941_v30, %s3014_s23 }
0x1627   :  { %v944_v48 = vpop.permute.xlu1 %943 }
0x1628   :  { %2650 = vmatmul.mubr.msk.bf16.vlgmr.msra.gmra.mrb[24].mxu0 %vm181_vm2, %v944_v48 }
0x1629   :  { %2662 = vmatpush3.bf16.msra.mxu0 %v3247_v1  ;;  %2665 = vmatprep.mubr.msk.bf16.mxu0 %vm3011_vm1, %v3010_v12 }
0x162a   :  { %2663 = vmatprep.subr.bf16.mxu0 %v3010_v12 }
0x162d   :  { %2664 = vmatpush3.bf16.msra.mxu0 %v3257_v4 }
0x162e   :  { %2677 = vmatprep.subr.bf16.mxu0 %v3010_v12 }
0x16fb   :  { %v982_v53 = vpop.f32.mrb[24].mxu0 }
0x16fc   :  { %v989_v31 = vrot.slane %v982_v53, 4  ;;  %v2651_v32 = vpop.f32.mrb[25].mxu0 }
0x16fd   :  { %v985_v33 = vpop.f32.mrb[26].mxu0 }
0x16fe   :  { %v991_v34 = vadd.f32 %v989_v31, %v3147_v50  ;;  %v2652_v36 = vpop.f32.mrb[27].mxu0 }
0x1700   :  { %2882 = vtanh.f32 %v991_v34  ;;  %v2406_v38 = vmul.f32 -1.442695, %v991_v34 }
0x1702   :  { %2884 = vpow2.f32 %v2406_v38 }
0x170a   :  { %v2883_v37 = vpop.eup %2882 }
0x170b   :  { %1004 = vrot.lane.b32.xlu0 %v2883_v37, %s3013_s22 }
0x170c   :  { %v2885_v39 = vpop.eup %2884 }
0x170d   :  { %v995_v40 = vadd.f32 1.0, %v2885_v39 }
0x170f   :  { %2886 = vrcp.f32 %v995_v40 }
0x1719   :  { %v2887_v41 = vpop.eup %2886 }
0x171a   :  { %v1002_v45 = vmul.f32 %v2887_v41, %v1000_v11 }
0x177d   :  { %v1005_v43 = vpop.permute.xlu0 %1004 }
0x177e   :  { %v1007_v44 = vmul.f32 %v2887_v41, %v1005_v43 }
0x1780   :  { %1009 = vrot.lane.b32.xlu1 %v1007_v44, %s3014_s23 }
0x17f2   :  { %v1010_v47 = vpop.permute.xlu1 %1009 }
0x17f3   :  { %v1012_v49 = vadd.f32 %v1010_v47, %v1002_v45 }
0x17f5   :  { %2888 = vtanh.f32 %v1012_v49  ;;  %v1076_v18 = vrot.slane %v1012_v49, 4 }
0x17ff   :  { %v2889_v51 = vpop.eup %2888 }
0x1800   :  { %1015 = vrot.lane.b32.xlu0 %v2889_v51, %s3013_s22 }
0x1872   :  { %v1016_v54 = vpop.permute.xlu0 %1015 }
0x1873   :  { %v1018_v57 = vmul.f32 %v2887_v41, %v1016_v54 }
0x1875   :  { %v1019_v58 = vpack.c.bf16 %v1018_v57, %v1018_v57 }
0x1877   :  { %v1021_v19 = vrot.slane %v1019_v58, 2 }
0x1879   :  { %1022 = vrot.lane.b32.xlu1 %v1021_v19, %s3014_s23 }
0x18eb   :  { %v1023_v59 = vpop.permute.xlu1 %1022 }
0x18ec   :  { %2658 = vmatmul.mubr.msk.bf16.vlgmr.msra.gmra.mrb[24].mxu1 %vm181_vm2, %v1023_v59 }
0x18ed   :  { %2670 = vmatpush3.bf16.msra.mxu1 %v3247_v1  ;;  %2673 = vmatprep.mubr.msk.bf16.mxu1 %vm3011_vm1, %v3010_v12 }
0x18ee   :  { %2671 = vmatprep.subr.bf16.mxu1 %v3010_v12 }
0x18f1   :  { %2672 = vmatpush3.bf16.msra.mxu1 %v3257_v4 }
0x18f2   :  { %2685 = vmatprep.subr.bf16.mxu1 %v3010_v12 }
0x19bf   :  { %v1061_v62 = vpop.f32.mrb[24].mxu1 }
0x19c0   :  { %v1067_v63 = vadd.f32 %v1061_v62, %v3147_v50  ;;  %v2659_v0 = vpop.f32.mrb[25].mxu1 }
0x19c1   :  { %v1064_v2 = vpop.f32.mrb[26].mxu1 }
0x19c2   :  { %2890 = vtanh.f32 %v1067_v63  ;;  %v2660_v24 = vpop.f32.mrb[27].mxu1  ;;  %v2408_v5 = vmul.f32 -1.442695, %v1067_v63 }
0x19c4   :  { %2892 = vpow2.f32 %v2408_v5 }
0x19cc   :  { %v2891_v3 = vpop.eup %2890 }
0x19cd   :  { %1080 = vrot.lane.b32.xlu0 %v2891_v3, %s3013_s22 }
0x19ce   :  { %v2893_v9 = vpop.eup %2892 }
0x19cf   :  { %v1071_v10 = vadd.f32 1.0, %v2893_v9 }
0x19d1   :  { %2894 = vrcp.f32 %v1071_v10 }
0x19db   :  { %v2895_v46 = vpop.eup %2894 }
0x19dc   :  { %v1078_v20 = vmul.f32 %v2895_v46, %v1076_v18 }
0x1a3f   :  { %v1081_v13 = vpop.permute.xlu0 %1080 }
0x1a40   :  { %v1083_v14 = vmul.f32 %v2895_v46, %v1081_v13 }
0x1a42   :  { %1085 = vrot.lane.b32.xlu1 %v1083_v14, %s3014_s23 }
0x1ab4   :  { %v1086_v50 = vpop.permute.xlu1 %1085 }
0x1ab5   :  { %v1088_v21 = vadd.f32 %v1086_v50, %v1078_v20 }
0x1ab7   :  { %2896 = vtanh.f32 %v1088_v21  ;;  %v1154_v43 = vrot.slane %v1088_v21, 4 }
0x1ac1   :  { %v2897_v23 = vpop.eup %2896 }
0x1ac2   :  { %1091 = vrot.lane.b32.xlu0 %v2897_v23, %s3013_s22 }
0x1b34   :  { %v1092_v25 = vpop.permute.xlu0 %1091 }
0x1b35   :  { %v1094_v17 = vmul.f32 %v2895_v46, %v1092_v25 }
0x1b37   :  { %v1095_v26 = vpack.c.bf16 %v1094_v17, %v1094_v17  ;;  %v3346_v27 = vsel %vm790_vm3, %v1094_v17, %v1018_v57 }
0x1b38   :  { %v1408_v30 = vpack.c.bf16 %v3351_v28, %v3346_v27 }
0x1b39   :  { %1097 = vrot.lane.b32.xlu1 %v1095_v26, %s3014_s23 }
0x1bab   :  { %v1098_v48 = vpop.permute.xlu1 %1097 }
0x1bac   :  { %2666 = vmatmul.mubr.msk.bf16.vlgmr.msra.gmra.mrb[28].mxu0 %vm181_vm2, %v1098_v48 }
0x1bad   :  { %2678 = vmatpush3.bf16.msra.mxu0 %v3247_v1  ;;  %2681 = vmatprep.mubr.msk.bf16.mxu0 %vm3011_vm1, %v3010_v12 }
0x1bae   :  { %2679 = vmatprep.subr.bf16.mxu0 %v3010_v12 }
0x1bb1   :  { %2680 = vmatpush3.bf16.msra.mxu0 %v3257_v4 }
0x1c7f   :  { %v1136_v53 = vpop.f32.mrb[28].mxu0 }
0x1c80   :  { %v1143_v56 = vrot.slane %v1136_v53, 4  ;;  %v2667_v29 = vpop.f32.mrb[29].mxu0 }
0x1c81   :  { %v1139_v31 = vpop.f32.mrb[30].mxu0 }
0x1c82   :  { %v1145_v32 = vadd.f32 %v1143_v56, %v3155_v55  ;;  %v2668_v33 = vpop.f32.mrb[31].mxu0 }
0x1c84   :  { %2898 = vtanh.f32 %v1145_v32  ;;  %v2410_v36 = vmul.f32 -1.442695, %v1145_v32 }
0x1c86   :  { %2900 = vpow2.f32 %v2410_v36 }
0x1c8e   :  { %v2899_v34 = vpop.eup %2898 }
0x1c8f   :  { %1158 = vrot.lane.b32.xlu0 %v2899_v34, %s3013_s22 }
0x1c90   :  { %v2901_v37 = vpop.eup %2900 }
0x1c91   :  { %v1149_v38 = vadd.f32 1.0, %v2901_v37 }
0x1c93   :  { %2902 = vrcp.f32 %v1149_v38  ;;  %v760_v38 = vrot.slane %v3311_v61, 4 }
0x1c9d   :  { %v2903_v39 = vpop.eup %2902 }
0x1c9e   :  { %v1156_v44 = vmul.f32 %v2903_v39, %v1154_v43  ;;  %v762_v43 = vadd.f32 %v760_v38, %v3114_v22  ;;  %v1487_v38 = vld [vmem:[%s3641_s4 + $0x20] sm:$0xff] }
0x1d01   :  { %v1159_v40 = vpop.permute.xlu0 %1158 }
0x1d02   :  { %v1161_v41 = vmul.f32 %v2903_v39, %v1159_v40 }
0x1d04   :  { %1163 = vrot.lane.b32.xlu1 %v1161_v41, %s3014_s23 }
0x1d76   :  { %v1164_v11 = vpop.permute.xlu1 %1163 }
0x1d77   :  { %v1166_v45 = vadd.f32 %v1164_v11, %v1156_v44 }
0x1d79   :  { %2904 = vtanh.f32 %v1166_v45 }
0x1d83   :  { %v2905_v47 = vpop.eup %2904 }
0x1d84   :  { %1169 = vrot.lane.b32.xlu0 %v2905_v47, %s3013_s22 }
0x1df6   :  { %v1170_v49 = vpop.permute.xlu0 %1169 }
0x1df7   :  { %v3366_v51 = vmul.f32 %v2903_v39, %v1170_v49 }
0x1df9   :  { %v1173_v54 = vpack.c.bf16 %v3366_v51, %v3366_v51 }
0x1dfb   :  { %v1175_v57 = vrot.slane %v1173_v54, 2 }
0x1dfd   :  { %1176 = vrot.lane.b32.xlu1 %v1175_v57, %s3014_s23 }
0x1e6f   :  { %v1177_v58 = vpop.permute.xlu1 %1176 }
0x1e70   :  { %2674 = vmatmul.mubr.msk.bf16.vlgmr.msra.gmra.mrb[28].mxu1 %vm181_vm2, %v1177_v58 }
0x1e71   :  { %2686 = vmatpush3.bf16.msra.mxu1 %v3247_v1  ;;  %2689 = vmatprep.mubr.msk.bf16.mxu1 %vm3011_vm1, %v3010_v12 }
0x1e72   :  { %2687 = vmatprep.subr.bf16.mxu1 %v3010_v12 }
0x1e75   :  { %2688 = vmatpush3.bf16.msra.mxu1 %v3257_v4  ;;  %v1230_v4 = vrot.slane %v1166_v45, 4  ;;  %v2401_v45 = vmul.f32 -1.442695, %v762_v43 }
0x1f43   :  { %v1215_v19 = vpop.f32.mrb[28].mxu1 }
0x1f44   :  { %v1221_v59 = vadd.f32 %v1215_v19, %v3155_v55  ;;  %v2675_v62 = vpop.f32.mrb[29].mxu1 }
0x1f45   :  { %v1218_v63 = vpop.f32.mrb[30].mxu1  ;;  %v771_v62 = vrot.slane %v3282_v42, 4  ;;  %v793_v42 = vsel %vm790_vm3, %v3217_v35, %v3236_v60 }
0x1f46   :  { %2906 = vtanh.f32 %v1221_v59  ;;  %v2676_v0 = vpop.f32.mrb[31].mxu1  ;;  %v2412_v24 = vmul.f32 -1.442695, %v1221_v59 }
0x1f48   :  { %2908 = vpow2.f32 %v2412_v24 }
0x1f50   :  { %v2907_v2 = vpop.eup %2906 }
0x1f51   :  { %1234 = vrot.lane.b32.xlu0 %v2907_v2, %s3013_s22 }
0x1f52   :  { %v2909_v1 = vpop.eup %2908 }
0x1f53   :  { %v1225_v3 = vadd.f32 1.0, %v2909_v1 }
0x1f55   :  { %2910 = vrcp.f32 %v1225_v3 }
0x1f5f   :  { %v2911_v5 = vpop.eup %2910 }
0x1f60   :  { %v1232_v46 = vmul.f32 %v2911_v5, %v1230_v4 }
0x1fc3   :  { %v1235_v9 = vpop.permute.xlu0 %1234 }
0x1fc4   :  { %v1237_v10 = vmul.f32 %v2911_v5, %v1235_v9 }
0x1fc6   :  { %1239 = vrot.lane.b32.xlu1 %v1237_v10, %s3014_s23 }
0x2038   :  { %v1240_v55 = vpop.permute.xlu1 %1239 }
0x2039   :  { %v1242_v13 = vadd.f32 %v1240_v55, %v1232_v46 }
0x203b   :  { %2912 = vtanh.f32 %v1242_v13  ;;  %v1308_v37 = vrot.slane %v1242_v13, 4 }
0x2045   :  { %v2913_v14 = vpop.eup %2912 }
0x2046   :  { %1245 = vrot.lane.b32.xlu0 %v2913_v14, %s3013_s22 }
0x20b8   :  { %v1246_v18 = vpop.permute.xlu0 %1245 }
0x20b9   :  { %v3381_v20 = vmul.f32 %v2911_v5, %v1246_v18 }
0x20bb   :  { %v1249_v50 = vpack.c.bf16 %v3381_v20, %v3381_v20  ;;  %v1404_v28 = vsel %vm790_vm3, %v3381_v20, %v3366_v51  ;;  %v1673_v51 = vld [vmem:[%s3642_s5] sm:$0xff]  ;;  %v1674_v20 = vld [vmem:[%s3642_s5 + $0x8] sm:$0xff] }
0x20bd   :  { %1251 = vrot.lane.b32.xlu1 %v1249_v50, %s3014_s23 }
0x212f   :  { %v1252_v21 = vpop.permute.xlu1 %1251 }
0x2130   :  { %2682 = vmatmul.mubr.msk.bf16.vlgmr.msra.gmra.mrb[32].mxu0 %vm181_vm2, %v1252_v21  ;;  %v1411_v21 = vld [vmem:[%s3641_s4 + $0x8] sm:$0xff] }
0x2203   :  { %v1290_v23 = vpop.f32.mrb[32].mxu0 }
0x2204   :  { %v1297_v25 = vrot.slane %v1290_v23, 4  ;;  %v2683_v17 = vpop.f32.mrb[33].mxu0  ;;  %v2423_v23 = vld [vmem:[%s3641_s4 + $0x40] sm:$0xff] }
0x2205   :  { %v1293_v26 = vpop.f32.mrb[34].mxu0  ;;  %v2424_v17 = vld [vmem:[%s3641_s4 + $0x48] sm:$0xff] }
0x2206   :  { %v1299_v48 = vadd.f32 %v1297_v25, %v3150_v52  ;;  %v2684_v53 = vpop.f32.mrb[35].mxu0  ;;  %v1565_v26 = vpack.c.bf16 %v2424_v17, %v2423_v23 }
0x2207   :  { %v1412_v53 = vld [vmem:[%s3641_s4 + $0x10] sm:$0xff] }
0x2208   :  { %2914 = vtanh.f32 %v1299_v48  ;;  %v2414_v29 = vmul.f32 -1.442695, %v1299_v48  ;;  %2709 = vmatprep.subr.bf16.mxu1 %v1565_v26 }
0x220a   :  { %2916 = vpow2.f32 %v2414_v29  ;;  %v2425_v29 = vld [vmem:[%s3641_s4 + $0x50] sm:$0xff] }
0x2212   :  { %v2915_v56 = vpop.eup %2914 }
0x2213   :  { %1312 = vrot.lane.b32.xlu0 %v2915_v56, %s3013_s22  ;;  %v1413_v56 = vld [vmem:[%s3641_s4 + $0x18] sm:$0xff] }
0x2214   :  { %v2917_v31 = vpop.eup %2916 }
0x2215   :  { %v1303_v32 = vadd.f32 1.0, %v2917_v31 }
0x2217   :  { %2918 = vrcp.f32 %v1303_v32  ;;  %v1415_v32 = vpack.c.bf16 %v1413_v56, %v1412_v53 }
0x2221   :  { %v2919_v33 = vpop.eup %2918 }
0x2222   :  { %v1310_v39 = vmul.f32 %v2919_v33, %v1308_v37 }
0x2285   :  { %v1313_v34 = vpop.permute.xlu0 %1312 }
0x2286   :  { %v1315_v36 = vmul.f32 %v2919_v33, %v1313_v34 }
0x2288   :  { %1317 = vrot.lane.b32.xlu1 %v1315_v36, %s3014_s23 }
0x22fa   :  { %v1318_v40 = vpop.permute.xlu1 %1317 }
0x22fb   :  { %v3391_v41 = vadd.f32 %v1318_v40, %v1310_v39  ;;  %v1488_v39 = vld [vmem:[%s3641_s4 + $0x28] sm:$0xff]  ;;  %v2430_v40 = vld [vmem:[%s3641_s4 + $0x60] sm:$0xff] }
0x22fd   :  { %2920 = vtanh.f32 %v3391_v41  ;;  %v1384_v48 = vrot.slane %v3391_v41, 4  ;;  %v1491_v41 = vpack.c.bf16 %v1488_v39, %v1487_v38 }
0x22fe   :  { %2922 = vtanh.f32 %v762_v43  ;;  %v2431_v43 = vld [vmem:[%s3641_s4 + $0x68] sm:$0xff] }
0x22ff   :  { %2924 = vpow2.f32 %v2401_v45 }
0x2307   :  { %v2921_v44 = vpop.eup %2920 }
0x2308   :  { %1323 = vrot.lane.b32.xlu0 %v2921_v44, %s3013_s22  ;;  %v2923_v11 = vpop.eup %2922  ;;  %v1624_v44 = vpack.c.bf16 %v2431_v43, %v2430_v40 }
0x2309   :  { %v2925_v47 = vpop.eup %2924 }
0x230a   :  { %v766_v49 = vadd.f32 1.0, %v2925_v47  ;;  %v1489_v47 = vld [vmem:[%s3641_s4 + $0x30] sm:$0xff] }
0x230c   :  { %775 = vrot.lane.b32.xlu0 %v2923_v11, %s3013_s22  ;;  %2926 = vrcp.f32 %v766_v49  ;;  %v1490_v49 = vld [vmem:[%s3641_s4 + $0x38] sm:$0xff] }
0x2316   :  { %v2927_v57 = vpop.eup %2926 }
0x2317   :  { %v773_v63 = vmul.f32 %v2927_v57, %v771_v62 }
0x237a   :  { %v1324_v61 = vpop.permute.xlu0 %1323 }
0x237b   :  { %v3397_v54 = vmul.f32 %v2919_v33, %v1324_v61  ;;  %v2426_v33 = vld [vmem:[%s3641_s4 + $0x58] sm:$0xff] }
0x237c   :  { %v1566_v36 = vpack.c.bf16 %v2426_v33, %v2425_v29 }
0x237d   :  { %v1327_v22 = vpack.c.bf16 %v3397_v54, %v3397_v54 }
0x237e   :  { %v776_v58 = vpop.permute.xlu0 %775 }
0x237f   :  { %v1329_v19 = vrot.slane %v1327_v22, 2  ;;  %v778_v59 = vmul.f32 %v2927_v57, %v776_v58  ;;  %v2432_v22 = vld [vmem:[%s3641_s4 + $0x70] sm:$0xff] }
0x2381   :  { %1330 = vrot.lane.b32.xlu1 %v1329_v19, %s3014_s23  ;;  %780 = vrot.lane.b32.xlu0 %v778_v59, %s3014_s23 }
0x23f3   :  { %v1331_v0 = vpop.permute.xlu1 %1330  ;;  %v781_v2 = vpop.permute.xlu0 %780 }
0x23f4   :  { %v783_v24 = vadd.f32 %v781_v2, %v773_v63  ;;  %2690 = vmatmul.mubr.msk.bf16.vlgmr.msra.gmra.mrb[32].mxu1 %vm181_vm2, %v1331_v0  ;;  %v1675_v63 = vld [vmem:[%s3642_s5 + $0x10] sm:$0xff]  ;;  %v1676_v0 = vld [vmem:[%s3642_s5 + $0x18] sm:$0xff] }
0x23f5   :  { %2710 = vmatpush3.bf16.msra.mxu1 %v1565_v26 }
0x23f6   :  { %2928 = vtanh.f32 %v783_v24  ;;  %2711 = vmatprep.subr.bf16.mxu1 %v1566_v36  ;;  %v3504_v24 = vpack.c.bf16 %v1676_v0, %v1675_v63 }
0x23f9   :  { %2712 = vmatpush3.bf16.msra.mxu1 %v1566_v36 }
0x23fa   :  { %2717 = vmatprep.subr.bf16.mxu1 %v1624_v44 }
0x2400   :  { %v2929_v1 = vpop.eup %2928 }
0x2401   :  { %786 = vrot.lane.b32.xlu0 %v2929_v1, %s3013_s22 }
0x2405   :  { %1418 = vrot.lane.b32.xlu0 %v795_v8, %s3014_s23 }
0x2473   :  { %v787_v3 = vpop.permute.xlu0 %786 }
0x2474   :  { %v789_v5 = vmul.f32 %v2927_v57, %v787_v3  ;;  %v2433_v57 = vld [vmem:[%s3641_s4 + $0x78] sm:$0xff]  ;;  %v2429_v3 = vld [vmem:[%s3643_s6 + $0x1] ss:$0 sm:$0xff] }
0x2475   :  { %v1625_v59 = vpack.c.bf16 %v2433_v57, %v2432_v22 }
0x2476   :  { %v794_v9 = vsel %vm790_vm3, %v3287_v15, %v789_v5 }
0x2477   :  { %v1419_v10 = vpop.permute.xlu0 %1418  ;;  %v796_v4 = vpack.c.bf16 %v794_v9, %v793_v42 }
0x2478   :  { %2697 = vmatprep.mubr.msk.bf16.mxu0 %vm181_vm2, %v1419_v10  ;;  %2713 = vmatprep.mubr.msk.bf16.mxu1 %vm181_vm2, %v1419_v10 }
0x24c7   :  { %v1369_v46 = vpop.f32.mrb[32].mxu1 }
0x24c8   :  { %v1375_v55 = vadd.f32 %v1369_v46, %v3150_v52  ;;  %v2691_v6 = vpop.f32.mrb[33].mxu1  ;;  %v1410_v52 = vld [vmem:[%s3641_s4] sm:$0xff] }
0x24c9   :  { %v1372_v7 = vpop.f32.mrb[34].mxu1  ;;  %v1414_v25 = vpack.c.bf16 %v1411_v21, %v1410_v52 }
0x24ca   :  { %2930 = vtanh.f32 %v1375_v55  ;;  %v2692_v8 = vpop.f32.mrb[35].mxu1  ;;  %v2416_v35 = vmul.f32 -1.442695, %v1375_v55 }
0x24cb   :  { %2693 = vmatprep.subr.bf16.mxu0 %v1414_v25 }
0x24cc   :  { %2932 = vpow2.f32 %v2416_v35  ;;  %2694 = vmatpush3.bf16.msra.mxu0 %v1414_v25 }
0x24cd   :  { %2695 = vmatprep.subr.bf16.mxu0 %v1415_v32 }
0x24d0   :  { %2696 = vmatpush3.bf16.msra.mxu0 %v1415_v32 }
0x24d1   :  { %2701 = vmatprep.subr.bf16.mxu0 %v1491_v41 }
0x24d4   :  { %v2931_v13 = vpop.eup %2930 }
0x24d5   :  { %1388 = vrot.lane.b32.xlu1 %v2931_v13, %s3013_s22 }
0x24d6   :  { %v2933_v60 = vpop.eup %2932 }
0x24d7   :  { %v1379_v15 = vadd.f32 1.0, %v2933_v60 }
0x24d9   :  { %2934 = vrcp.f32 %v1379_v15 }
0x24e3   :  { %v2935_v14 = vpop.eup %2934 }
0x24e4   :  { %v1386_v31 = vmul.f32 %v2935_v14, %v1384_v48 }
0x2547   :  { %v1389_v18 = vpop.permute.xlu1 %1388 }
0x2548   :  { %v1391_v50 = vmul.f32 %v2935_v14, %v1389_v18 }
0x254a   :  { %1393 = vrot.lane.b32.xlu1 %v1391_v50, %s3014_s23 }
0x25bc   :  { %v1394_v34 = vpop.permute.xlu1 %1393 }
0x25bd   :  { %v1396_v37 = vadd.f32 %v1394_v34, %v1386_v31 }
0x25bf   :  { %2936 = vtanh.f32 %v1396_v37 }
0x25c9   :  { %v2937_v11 = vpop.eup %2936 }
0x25ca   :  { %1399 = vrot.lane.b32.xlu1 %v2937_v11, %s3013_s22 }
0x25ce   :  { %1420 = vrot.lane.b32.xlu1 %v796_v4, %s3014_s23  ;;  %v2419_v4 = vld [vmem:[%s3643_s6] ss:$0 sm:$0xff] }
0x25d2   :  { %1497 = vrot.lane.b32.xlu1 %v1408_v30, %s3014_s23  ;;  %v1492_v30 = vpack.c.bf16 %v1490_v49, %v1489_v47 }
0x263c   :  { %v1400_v45 = vpop.permute.xlu1 %1399 }
0x263d   :  { %v1402_v61 = vmul.f32 %v2935_v14, %v1400_v45 }
0x263f   :  { %v1403_v27 = vsel %vm790_vm3, %v1402_v61, %v3397_v54  ;;  %v3491_v54 = vpack.c.bf16 %v1674_v20, %v1673_v51 }
0x2640   :  { %v1421_v58 = vpop.permute.xlu1 %1420  ;;  %v1407_v19 = vpack.c.bf16 %v1404_v28, %v1403_v27 }
0x2641   :  { %2698 = vmatmul.mubr.msk.bf16.vlgmr.msra.gmra.mrb[36].mxu0 %vm181_vm2, %v1421_v58  ;;  %2714 = vmatmul.mubr.msk.bf16.vlgmr.msra.gmra.mrb[36].mxu1 %vm181_vm2, %v1421_v58 }
0x2642   :  { %1495 = vrot.lane.b32.xlu0 %v1407_v19, %s3014_s23  ;;  %2702 = vmatpush3.bf16.msra.mxu0 %v1491_v41 }
0x2643   :  { %2718 = vmatpush3.bf16.msra.mxu1 %v1624_v44  ;;  %2703 = vmatprep.subr.bf16.mxu0 %v1492_v30 }
0x2644   :  { %2719 = vmatprep.subr.bf16.mxu1 %v1625_v59  ;;  %v1498_v2 = vpop.permute.xlu1 %1497 }
0x2646   :  { %2704 = vmatpush3.bf16.msra.mxu0 %v1492_v30 }
0x2647   :  { %2720 = vmatpush3.bf16.msra.mxu1 %v1625_v59  ;;  %2725 = vmatprep.subr.bf16.mxu0 %v3010_v12 }
0x2648   :  { %2733 = vmatprep.subr.bf16.mxu1 %v3010_v12 }
0x26b4   :  { %v1496_v62 = vpop.permute.xlu0 %1495 }
0x26b5   :  { %2705 = vmatprep.mubr.msk.bf16.mxu0 %vm181_vm2, %v1496_v62  ;;  %2721 = vmatprep.mubr.msk.bf16.mxu1 %vm181_vm2, %v1496_v62 }
0x26b6   :  { %2706 = vmatmul.mubr.msk.bf16.vlgmr.msra.gmra.mrb[36].mxu0 %vm181_vm2, %v1498_v2  ;;  %2722 = vmatmul.mubr.msk.bf16.vlgmr.msra.gmra.mrb[40].mxu1 %vm181_vm2, %v1498_v2 }
0x26b7   :  { %2726 = vmatpush3.bf16.msra.mxu0 %v3491_v54  ;;  %2729 = vmatprep.mubr.msk.bf16.mxu0 %vm3011_vm1, %v3010_v12 }
0x26b8   :  { %2727 = vmatprep.subr.bf16.mxu0 %v3010_v12  ;;  %2734 = vmatpush3.bf16.msra.mxu1 %v3491_v54 }
0x26b9   :  { %2735 = vmatprep.subr.bf16.mxu1 %v3010_v12  ;;  %2737 = vmatprep.mubr.msk.bf16.mxu1 %vm3011_vm1, %v3010_v12 }
0x26bb   :  { %2728 = vmatpush3.bf16.msra.mxu0 %v3504_v24 }
0x26bc   :  { %2736 = vmatpush3.bf16.msra.mxu1 %v3504_v24  ;;  %2741 = vmatprep.subr.bf16.mxu0 %v3010_v12 }
0x26bd   :  { %2749 = vmatprep.subr.bf16.mxu1 %v3010_v12 }
0x26be   :  { %2730 = vmatmul.mubr.bf16.vlgmr.msra.gmra.mrb[40].mxu0 %v3012_v16 }
0x26bf   :  { %2742 = vmatpush3.bf16.msra.mxu0 %v3491_v54  ;;  %2745 = vmatprep.mubr.msk.bf16.mxu0 %vm3011_vm1, %v3010_v12 }
0x26c0   :  { %2743 = vmatprep.subr.bf16.mxu0 %v3010_v12 }
0x26c3   :  { %2744 = vmatpush3.bf16.msra.mxu0 %v3504_v24 }
0x26c4   :  { %2757 = vmatprep.subr.bf16.mxu0 %v3010_v12 }
0x2714   :  { %v2715_v1 = vpop.f32.mrb[36].mxu1 }
0x2715   :  { %v1601_v5 = vpop.f32.mrb[37].mxu1 }
0x2716   :  { %v2716_v42 = vpop.f32.mrb[38].mxu1 }
0x2717   :  { %v1619_v9 = vadd.f32 %v2716_v42, %v2429_v3  ;;  %v1603_v10 = vpop.f32.mrb[39].mxu1 }
0x2789   :  { %v2707_v46 = vpop.f32.mrb[36].mxu0  ;;  %v2723_v55 = vpop.f32.mrb[40].mxu1 }
0x278a   :  { %v3530_v6 = vadd.f32 %v2707_v46, %v2419_v4  ;;  %v1539_v7 = vpop.f32.mrb[37].mxu0  ;;  %v1660_v8 = vpop.f32.mrb[41].mxu1 }
0x278b   :  { %v2708_v13 = vpop.f32.mrb[38].mxu0  ;;  %v2724_v35 = vpop.f32.mrb[42].mxu1  ;;  %v2798_v52 = vadd.f32 %v2419_v4, %v1539_v7 }
0x278c   :  { %v3532_v60 = vadd.f32 %v2708_v13, %v2419_v4  ;;  %v3534_v15 = vadd.f32 %v2724_v35, %v1619_v9  ;;  %v1542_v14 = vpop.f32.mrb[39].mxu0  ;;  %v1662_v18 = vpop.f32.mrb[43].mxu1 }
0x278d   :  { %v3536_v50 = vadd.f32 %v2419_v4, %v1542_v14 }
0x2791   :  { %v1720_v21 = vpop.f32.mrb[40].mxu0 }
0x2792   :  { %v1726_v23 = vadd.f32 %v2798_v52, %v1720_v21  ;;  %v2731_v25 = vpop.f32.mrb[41].mxu0 }
0x2793   :  { %v1723_v17 = vpop.f32.mrb[42].mxu0 }
0x2794   :  { %2938 = vtanh.f32 %v1726_v23  ;;  %v2732_v26 = vpop.f32.mrb[43].mxu0  ;;  %v2440_v53 = vmul.f32 -1.442695, %v1726_v23 }
0x2796   :  { %2940 = vpow2.f32 %v2440_v53 }
0x279e   :  { %v2939_v48 = vpop.eup %2938 }
0x279f   :  { %1736 = vrot.lane.b32.xlu0 %v2939_v48, %s3013_s22 }
0x27a0   :  { %v2941_v56 = vpop.eup %2940 }
0x27a1   :  { %v1730_v29 = vadd.f32 1.0, %v2941_v56 }
0x27a3   :  { %2942 = vrcp.f32 %v1730_v29 }
0x27ad   :  { %v2943_v31 = vpop.eup %2942 }
0x27ae   :  { %v1734_v34 = vmul.f32 0.0, %v2943_v31 }
0x2811   :  { %v1737_v32 = vpop.permute.xlu0 %1736 }
0x2812   :  { %v1739_v33 = vmul.f32 %v2943_v31, %v1737_v32 }
0x2814   :  { %1741 = vrot.lane.b32.xlu1 %v1739_v33, %s3014_s23 }
0x2886   :  { %v1742_v36 = vpop.permute.xlu1 %1741 }
0x2887   :  { %v1744_v37 = vadd.f32 %v1742_v36, %v1734_v34 }
0x2889   :  { %2944 = vtanh.f32 %v1744_v37  ;;  %v1810_v59 = vrot.slane %v1744_v37, 4 }
0x2893   :  { %v2945_v38 = vpop.eup %2944 }
0x2894   :  { %1747 = vrot.lane.b32.xlu0 %v2945_v38, %s3013_s22 }
0x2906   :  { %v1748_v39 = vpop.permute.xlu0 %1747 }
0x2907   :  { %v1750_v40 = vmul.f32 %v2943_v31, %v1748_v39 }
0x2909   :  { %v1751_v41 = vpack.c.bf16 %v1750_v40, %v1750_v40 }
0x290b   :  { %1753 = vrot.lane.b32.xlu1 %v1751_v41, %s3014_s23 }
0x297d   :  { %v1754_v43 = vpop.permute.xlu1 %1753 }
0x297e   :  { %2738 = vmatmul.mubr.msk.bf16.vlgmr.msra.gmra.mrb[44].mxu1 %vm181_vm2, %v1754_v43 }
0x297f   :  { %2750 = vmatpush3.bf16.msra.mxu1 %v3491_v54  ;;  %2753 = vmatprep.mubr.msk.bf16.mxu1 %vm3011_vm1, %v3010_v12 }
0x2980   :  { %2751 = vmatprep.subr.bf16.mxu1 %v3010_v12 }
0x2983   :  { %2752 = vmatpush3.bf16.msra.mxu1 %v3504_v24 }
0x2984   :  { %2765 = vmatprep.subr.bf16.mxu1 %v3010_v12 }
0x2a51   :  { %v1792_v44 = vpop.f32.mrb[44].mxu1 }
0x2a52   :  { %v1799_v11 = vrot.slane %v1792_v44, 4  ;;  %v2739_v45 = vpop.f32.mrb[45].mxu1 }
0x2a53   :  { %v1795_v47 = vpop.f32.mrb[46].mxu1 }
0x2a54   :  { %v1801_v49 = vadd.f32 %v2798_v52, %v1799_v11  ;;  %v2740_v61 = vpop.f32.mrb[47].mxu1 }
0x2a56   :  { %2946 = vtanh.f32 %v1801_v49  ;;  %v2442_v57 = vmul.f32 -1.442695, %v1801_v49 }
0x2a58   :  { %2948 = vpow2.f32 %v2442_v57 }
0x2a60   :  { %v2947_v22 = vpop.eup %2946 }
0x2a61   :  { %1814 = vrot.lane.b32.xlu0 %v2947_v22, %s3013_s22 }
0x2a62   :  { %v2949_v27 = vpop.eup %2948 }
0x2a63   :  { %v1805_v28 = vadd.f32 1.0, %v2949_v27 }
0x2a65   :  { %2950 = vrcp.f32 %v1805_v28 }
0x2a6f   :  { %v2951_v30 = vpop.eup %2950 }
0x2a70   :  { %v1812_v51 = vmul.f32 %v2951_v30, %v1810_v59 }
0x2ad3   :  { %v1815_v58 = vpop.permute.xlu0 %1814 }
0x2ad4   :  { %v1817_v19 = vmul.f32 %v2951_v30, %v1815_v58 }
0x2ad6   :  { %1819 = vrot.lane.b32.xlu1 %v1817_v19, %s3014_s23 }
0x2b48   :  { %v1820_v20 = vpop.permute.xlu1 %1819 }
0x2b49   :  { %v1822_v62 = vadd.f32 %v1820_v20, %v1812_v51 }
0x2b4b   :  { %2952 = vtanh.f32 %v1822_v62  ;;  %v1886_v52 = vrot.slane %v1822_v62, 4 }
0x2b55   :  { %v2953_v63 = vpop.eup %2952 }
0x2b56   :  { %1825 = vrot.lane.b32.xlu0 %v2953_v63, %s3013_s22 }
0x2bc8   :  { %v1826_v0 = vpop.permute.xlu0 %1825 }
0x2bc9   :  { %v1828_v2 = vmul.f32 %v2951_v30, %v1826_v0 }
0x2bcb   :  { %v1829_v1 = vpack.c.bf16 %v1828_v2, %v1828_v2 }
0x2bcd   :  { %v1831_v3 = vrot.slane %v1829_v1, 2 }
0x2bcf   :  { %1832 = vrot.lane.b32.xlu1 %v1831_v3, %s3014_s23 }
0x2c41   :  { %v1833_v5 = vpop.permute.xlu1 %1832 }
0x2c42   :  { %2746 = vmatmul.mubr.msk.bf16.vlgmr.msra.gmra.mrb[44].mxu0 %vm181_vm2, %v1833_v5 }
0x2c43   :  { %2758 = vmatpush3.bf16.msra.mxu0 %v3491_v54  ;;  %2761 = vmatprep.mubr.msk.bf16.mxu0 %vm3011_vm1, %v3010_v12 }
0x2c44   :  { %2759 = vmatprep.subr.bf16.mxu0 %v3010_v12 }
0x2c47   :  { %2760 = vmatpush3.bf16.msra.mxu0 %v3504_v24 }
0x2c48   :  { %2773 = vmatprep.subr.bf16.mxu0 %v3010_v12 }
0x2d15   :  { %v1871_v42 = vpop.f32.mrb[44].mxu0 }
0x2d16   :  { %v1877_v9 = vadd.f32 %v3536_v50, %v1871_v42  ;;  %v2747_v10 = vpop.f32.mrb[45].mxu0 }
0x2d17   :  { %v1874_v4 = vpop.f32.mrb[46].mxu0 }
0x2d18   :  { %2954 = vtanh.f32 %v1877_v9  ;;  %v2748_v46 = vpop.f32.mrb[47].mxu0  ;;  %v2444_v7 = vmul.f32 -1.442695, %v1877_v9 }
0x2d1a   :  { %2956 = vpow2.f32 %v2444_v7 }
0x2d22   :  { %v2955_v55 = vpop.eup %2954 }
0x2d23   :  { %1890 = vrot.lane.b32.xlu0 %v2955_v55, %s3013_s22 }
0x2d24   :  { %v2957_v8 = vpop.eup %2956 }
0x2d25   :  { %v1881_v13 = vadd.f32 1.0, %v2957_v8 }
0x2d27   :  { %2958 = vrcp.f32 %v1881_v13 }
0x2d31   :  { %v2959_v35 = vpop.eup %2958 }
0x2d32   :  { %v1888_v21 = vmul.f32 %v2959_v35, %v1886_v52 }
0x2d95   :  { %v1891_v14 = vpop.permute.xlu0 %1890 }
0x2d96   :  { %v1893_v18 = vmul.f32 %v2959_v35, %v1891_v14 }
0x2d98   :  { %1895 = vrot.lane.b32.xlu1 %v1893_v18, %s3014_s23 }
0x2e0a   :  { %v1896_v23 = vpop.permute.xlu1 %1895 }
0x2e0b   :  { %v1898_v25 = vadd.f32 %v1896_v23, %v1888_v21 }
0x2e0d   :  { %2960 = vtanh.f32 %v1898_v25  ;;  %v1964_v11 = vrot.slane %v1898_v25, 4 }
0x2e17   :  { %v2961_v17 = vpop.eup %2960 }
0x2e18   :  { %1901 = vrot.lane.b32.xlu0 %v2961_v17, %s3013_s22 }
0x2e8a   :  { %v1902_v26 = vpop.permute.xlu0 %1901 }
0x2e8b   :  { %v1904_v48 = vmul.f32 %v2959_v35, %v1902_v26 }
0x2e8d   :  { %v1905_v53 = vpack.c.bf16 %v1904_v48, %v1904_v48 }
0x2e8f   :  { %1907 = vrot.lane.b32.xlu1 %v1905_v53, %s3014_s23 }
0x2f01   :  { %v1908_v56 = vpop.permute.xlu1 %1907 }
0x2f02   :  { %2754 = vmatmul.mubr.msk.bf16.vlgmr.msra.gmra.mrb[48].mxu1 %vm181_vm2, %v1908_v56 }
0x2f03   :  { %2766 = vmatpush3.bf16.msra.mxu1 %v3491_v54  ;;  %2769 = vmatprep.mubr.msk.bf16.mxu1 %vm3011_vm1, %v3010_v12 }
0x2f04   :  { %2767 = vmatprep.subr.bf16.mxu1 %v3010_v12 }
0x2f07   :  { %2768 = vmatpush3.bf16.msra.mxu1 %v3504_v24 }
0x2f08   :  { %2781 = vmatprep.subr.bf16.mxu1 %v3010_v12 }
0x2fd5   :  { %v1946_v29 = vpop.f32.mrb[48].mxu1 }
0x2fd6   :  { %v1953_v31 = vrot.slane %v1946_v29, 4  ;;  %v2755_v32 = vpop.f32.mrb[49].mxu1 }
0x2fd7   :  { %v1949_v33 = vpop.f32.mrb[50].mxu1 }
0x2fd8   :  { %v1955_v34 = vadd.f32 %v3536_v50, %v1953_v31  ;;  %v2756_v36 = vpop.f32.mrb[51].mxu1 }
0x2fda   :  { %2962 = vtanh.f32 %v1955_v34  ;;  %v2446_v38 = vmul.f32 -1.442695, %v1955_v34 }
0x2fdc   :  { %2964 = vpow2.f32 %v2446_v38  ;;  %v2437_v38 = vld [vmem:[%s3642_s5 + $0x28] sm:$0xff] }
0x2fe4   :  { %v2963_v37 = vpop.eup %2962 }
0x2fe5   :  { %1968 = vrot.lane.b32.xlu0 %v2963_v37, %s3013_s22  ;;  %v2436_v37 = vld [vmem:[%s3642_s5 + $0x20] sm:$0xff] }
0x2fe6   :  { %v2965_v39 = vpop.eup %2964 }
0x2fe7   :  { %v1959_v40 = vadd.f32 1.0, %v2965_v39  ;;  %v1684_v39 = vpack.c.bf16 %v2437_v38, %v2436_v37 }
0x2fe9   :  { %2966 = vrcp.f32 %v1959_v40  ;;  %v2438_v40 = vld [vmem:[%s3642_s5 + $0x30] sm:$0xff] }
0x2ff3   :  { %v2967_v41 = vpop.eup %2966 }
0x2ff4   :  { %v1966_v45 = vmul.f32 %v2967_v41, %v1964_v11 }
0x3057   :  { %v1969_v43 = vpop.permute.xlu0 %1968 }
0x3058   :  { %v1971_v44 = vmul.f32 %v2967_v41, %v1969_v43 }
0x305a   :  { %1973 = vrot.lane.b32.xlu1 %v1971_v44, %s3014_s23 }
0x30cc   :  { %v1974_v47 = vpop.permute.xlu1 %1973 }
0x30cd   :  { %v1976_v49 = vadd.f32 %v1974_v47, %v1966_v45 }
0x30cf   :  { %2968 = vtanh.f32 %v1976_v49  ;;  %v2040_v5 = vrot.slane %v1976_v49, 4 }
0x30d9   :  { %v2969_v50 = vpop.eup %2968 }
0x30da   :  { %1979 = vrot.lane.b32.xlu0 %v2969_v50, %s3013_s22 }
0x314c   :  { %v1980_v61 = vpop.permute.xlu0 %1979 }
0x314d   :  { %v1982_v22 = vmul.f32 %v2967_v41, %v1980_v61  ;;  %v2439_v41 = vld [vmem:[%s3642_s5 + $0x38] sm:$0xff] }
0x314e   :  { %v1685_v44 = vpack.c.bf16 %v2439_v41, %v2438_v40 }
0x314f   :  { %v1983_v57 = vpack.c.bf16 %v1982_v22, %v1982_v22 }
0x3151   :  { %v1985_v27 = vrot.slane %v1983_v57, 2 }
0x3153   :  { %1986 = vrot.lane.b32.xlu1 %v1985_v27, %s3014_s23 }
0x31c5   :  { %v1987_v28 = vpop.permute.xlu1 %1986 }
0x31c6   :  { %2762 = vmatmul.mubr.msk.bf16.vlgmr.msra.gmra.mrb[48].mxu0 %vm181_vm2, %v1987_v28 }
0x31c7   :  { %2774 = vmatpush3.bf16.msra.mxu0 %v3491_v54  ;;  %2777 = vmatprep.mubr.msk.bf16.mxu0 %vm3011_vm1, %v3010_v12 }
0x31c8   :  { %2775 = vmatprep.subr.bf16.mxu0 %v3010_v12 }
0x31cb   :  { %2776 = vmatpush3.bf16.msra.mxu0 %v3504_v24 }
0x31cc   :  { %2789 = vmatprep.subr.bf16.mxu0 %v3010_v12 }
0x3299   :  { %v2025_v30 = vpop.f32.mrb[48].mxu0 }
0x329a   :  { %v2031_v58 = vadd.f32 %v3530_v6, %v2025_v30  ;;  %v2763_v19 = vpop.f32.mrb[49].mxu0 }
0x329b   :  { %v2028_v59 = vpop.f32.mrb[50].mxu0 }
0x329c   :  { %2970 = vtanh.f32 %v2031_v58  ;;  %v2764_v51 = vpop.f32.mrb[51].mxu0  ;;  %v2448_v62 = vmul.f32 -1.442695, %v2031_v58 }
0x329e   :  { %2972 = vpow2.f32 %v2448_v62 }
0x32a6   :  { %v2971_v20 = vpop.eup %2970 }
0x32a7   :  { %2044 = vrot.lane.b32.xlu0 %v2971_v20, %s3013_s22 }
0x32a8   :  { %v2973_v63 = vpop.eup %2972 }
0x32a9   :  { %v2035_v0 = vadd.f32 1.0, %v2973_v63 }
0x32ab   :  { %2974 = vrcp.f32 %v2035_v0 }
0x32b5   :  { %v2975_v2 = vpop.eup %2974 }
0x32b6   :  { %v2042_v42 = vmul.f32 %v2975_v2, %v2040_v5 }
0x3319   :  { %v2045_v1 = vpop.permute.xlu0 %2044 }
0x331a   :  { %v2047_v3 = vmul.f32 %v2975_v2, %v2045_v1 }
0x331c   :  { %2049 = vrot.lane.b32.xlu1 %v2047_v3, %s3014_s23 }
0x338e   :  { %v2050_v9 = vpop.permute.xlu1 %2049 }
0x338f   :  { %v2052_v10 = vadd.f32 %v2050_v9, %v2042_v42 }
0x3391   :  { %2976 = vtanh.f32 %v2052_v10 }
0x339b   :  { %v2977_v4 = vpop.eup %2976 }
0x339c   :  { %2055 = vrot.lane.b32.xlu0 %v2977_v4, %s3013_s22 }
0x340e   :  { %v2056_v46 = vpop.permute.xlu0 %2055 }
0x340f   :  { %v2058_v55 = vmul.f32 %v2975_v2, %v2056_v46 }
0x3411   :  { %v2059_v7 = vpack.c.bf16 %v2058_v55, %v2058_v55 }
0x3413   :  { %2061 = vrot.lane.b32.xlu1 %v2059_v7, %s3014_s23 }
0x3485   :  { %v2062_v8 = vpop.permute.xlu1 %2061 }
0x3486   :  { %2770 = vmatmul.mubr.msk.bf16.vlgmr.msra.gmra.mrb[52].mxu1 %vm181_vm2, %v2062_v8 }
0x3487   :  { %2782 = vmatpush3.bf16.msra.mxu1 %v3491_v54  ;;  %2785 = vmatprep.mubr.msk.bf16.mxu1 %vm3011_vm1, %v3010_v12 }
0x3488   :  { %2783 = vmatprep.subr.bf16.mxu1 %v3010_v12 }
0x348b   :  { %2784 = vmatpush3.bf16.msra.mxu1 %v3504_v24  ;;  %v2118_v24 = vrot.slane %v2052_v10, 4 }
0x3559   :  { %v2100_v13 = vpop.f32.mrb[52].mxu1 }
0x355a   :  { %v2107_v35 = vrot.slane %v2100_v13, 4  ;;  %v2771_v14 = vpop.f32.mrb[53].mxu1 }
0x355b   :  { %v2103_v18 = vpop.f32.mrb[54].mxu1 }
0x355c   :  { %v2109_v52 = vadd.f32 %v3530_v6, %v2107_v35  ;;  %v2772_v21 = vpop.f32.mrb[55].mxu1 }
0x355e   :  { %2978 = vtanh.f32 %v2109_v52  ;;  %v2450_v25 = vmul.f32 -1.442695, %v2109_v52 }
0x3560   :  { %2980 = vpow2.f32 %v2450_v25 }
0x3568   :  { %v2979_v23 = vpop.eup %2978 }
0x3569   :  { %2122 = vrot.lane.b32.xlu0 %v2979_v23, %s3013_s22 }
0x356a   :  { %v2981_v54 = vpop.eup %2980 }
0x356b   :  { %v2113_v17 = vadd.f32 1.0, %v2981_v54 }
0x356d   :  { %2982 = vrcp.f32 %v2113_v17 }
0x3577   :  { %v2983_v26 = vpop.eup %2982 }
0x3578   :  { %v2120_v56 = vmul.f32 %v2983_v26, %v2118_v24 }
0x35db   :  { %v2123_v48 = vpop.permute.xlu0 %2122 }
0x35dc   :  { %v2125_v53 = vmul.f32 %v2983_v26, %v2123_v48 }
0x35de   :  { %2127 = vrot.lane.b32.xlu1 %v2125_v53, %s3014_s23 }
0x3650   :  { %v2128_v29 = vpop.permute.xlu1 %2127 }
0x3651   :  { %v2130_v31 = vadd.f32 %v2128_v29, %v2120_v56 }
0x3653   :  { %2984 = vtanh.f32 %v2130_v31  ;;  %v2194_v62 = vrot.slane %v2130_v31, 4 }
0x365d   :  { %v2985_v6 = vpop.eup %2984 }
0x365e   :  { %2133 = vrot.lane.b32.xlu0 %v2985_v6, %s3013_s22 }
0x36d0   :  { %v2134_v32 = vpop.permute.xlu0 %2133 }
0x36d1   :  { %v2136_v33 = vmul.f32 %v2983_v26, %v2134_v32 }
0x36d3   :  { %v2137_v34 = vpack.c.bf16 %v2136_v33, %v2136_v33 }
0x36d5   :  { %v2139_v36 = vrot.slane %v2137_v34, 2 }
0x36d7   :  { %2140 = vrot.lane.b32.xlu1 %v2139_v36, %s3014_s23 }
0x3749   :  { %v2141_v43 = vpop.permute.xlu1 %2140 }
0x374a   :  { %2778 = vmatmul.mubr.msk.bf16.vlgmr.msra.gmra.mrb[52].mxu0 %vm181_vm2, %v2141_v43 }
0x374b   :  { %2790 = vmatpush3.bf16.msra.mxu0 %v1684_v39  ;;  %2793 = vmatprep.mubr.msk.bf16.mxu0 %vm3011_vm1, %v3010_v12 }
0x374c   :  { %2791 = vmatprep.subr.bf16.mxu0 %v3010_v12 }
0x374f   :  { %2792 = vmatpush3.bf16.msra.mxu0 %v1685_v44 }
0x3752   :  { %2794 = vmatmul.mubr.bf16.vlgmr.msra.gmra.mrb[56].mxu0 %v3012_v16 }
0x381d   :  { %v2179_v11 = vpop.f32.mrb[52].mxu0 }
0x381e   :  { %v2185_v45 = vadd.f32 %v3532_v60, %v2179_v11  ;;  %v2779_v47 = vpop.f32.mrb[53].mxu0 }
0x381f   :  { %v2182_v49 = vpop.f32.mrb[54].mxu0 }
0x3820   :  { %2986 = vtanh.f32 %v2185_v45  ;;  %v2780_v50 = vpop.f32.mrb[55].mxu0  ;;  %v2452_v12 = vmul.f32 -1.442695, %v2185_v45 }
0x3822   :  { %2988 = vpow2.f32 %v2452_v12 }
0x3825   :  { %v2325_v61 = vpop.f32.mrb[56].mxu0 }
0x3826   :  { %v2332_v22 = vrot.slane %v2325_v61, 4  ;;  %v2795_v57 = vpop.f32.mrb[57].mxu0 }
0x3827   :  { %v2328_v27 = vpop.f32.mrb[58].mxu0 }
0x3828   :  { %v2334_v28 = vadd.f32 %v2332_v22, %v3534_v15  ;;  %v2796_v30 = vpop.f32.mrb[59].mxu0 }
0x382a   :  { %v2987_v58 = vpop.eup %2986  ;;  %v2455_v9 = vmul.f32 -1.442695, %v2334_v28 }
0x382b   :  { %2198 = vrot.lane.b32.xlu0 %v2987_v58, %s3013_s22 }
0x382c   :  { %v2989_v16 = vpop.eup %2988 }
0x382d   :  { %v2189_v19 = vadd.f32 1.0, %v2989_v16 }
0x382f   :  { %2990 = vrcp.f32 %v2189_v19 }
0x3839   :  { %v2991_v59 = vpop.eup %2990 }
0x383a   :  { %v2196_v63 = vmul.f32 %v2991_v59, %v2194_v62 }
0x389d   :  { %v2199_v51 = vpop.permute.xlu0 %2198 }
0x389e   :  { %v2201_v20 = vmul.f32 %v2991_v59, %v2199_v51 }
0x38a0   :  { %2203 = vrot.lane.b32.xlu1 %v2201_v20, %s3014_s23 }
0x3912   :  { %v2204_v0 = vpop.permute.xlu1 %2203 }
0x3913   :  { %v2206_v2 = vadd.f32 %v2204_v0, %v2196_v63 }
0x3915   :  { %2992 = vtanh.f32 %v2206_v2 }
0x3916   :  { %2994 = vtanh.f32 %v2334_v28 }
0x3917   :  { %2996 = vpow2.f32 %v2455_v9 }
0x391f   :  { %v2993_v15 = vpop.eup %2992 }
0x3920   :  { %2209 = vrot.lane.b32.xlu0 %v2993_v15, %s3013_s22  ;;  %v2995_v42 = vpop.eup %2994 }
0x3921   :  { %v2997_v10 = vpop.eup %2996 }
0x3922   :  { %v2338_v4 = vadd.f32 1.0, %v2997_v10 }
0x3924   :  { %2998 = vrcp.f32 %v2338_v4 }
0x392e   :  { %v2999_v55 = vpop.eup %2998 }
0x392f   :  { %v2342_v13 = vmul.f32 0.0, %v2999_v55 }
0x3992   :  { %v2210_v1 = vpop.permute.xlu0 %2209 }
0x3993   :  { %v2212_v3 = vmul.f32 %v2991_v59, %v2210_v1 }
0x3995   :  { %v2213_v5 = vpack.c.bf16 %v2212_v3, %v2212_v3 }
0x3997   :  { %2215 = vrot.lane.b32.xlu1 %v2213_v5, %s3014_s23 }
0x399b   :  { %2344 = vrot.lane.b32.xlu1 %v2995_v42, %s3013_s22 }
0x3a09   :  { %v2216_v46 = vpop.permute.xlu1 %2215 }
0x3a0a   :  { %2786 = vmatmul.mubr.msk.bf16.vlgmr.msra.gmra.mrb[56].mxu1 %vm181_vm2, %v2216_v46 }
0x3a0d   :  { %v2345_v7 = vpop.permute.xlu1 %2344 }
0x3a0e   :  { %v2347_v8 = vmul.f32 %v2999_v55, %v2345_v7 }
0x3a10   :  { %2349 = vrot.lane.b32.xlu1 %v2347_v8, %s3014_s23 }
0x3a82   :  { %v2350_v35 = vpop.permute.xlu1 %2349 }
0x3a83   :  { %v2352_v14 = vadd.f32 %v2350_v35, %v2342_v13 }
0x3a85   :  { %3000 = vtanh.f32 %v2352_v14 }
0x3a8f   :  { %v3001_v18 = vpop.eup %3000 }
0x3a90   :  { %2355 = vrot.lane.b32.xlu1 %v3001_v18, %s3013_s22 }
0x3add   :  { %v2254_v52 = vpop.f32.mrb[56].mxu1 }
0x3ade   :  { %v2261_v21 = vrot.slane %v2254_v52, 4  ;;  %v2787_v23 = vpop.f32.mrb[57].mxu1 }
0x3adf   :  { %v2257_v25 = vpop.f32.mrb[58].mxu1 }
0x3ae0   :  { %v2263_v54 = vadd.f32 %v3532_v60, %v2261_v21  ;;  %v2788_v17 = vpop.f32.mrb[59].mxu1  ;;  %v2272_v60 = vrot.slane %v2206_v2, 4 }
0x3ae2   :  { %3002 = vtanh.f32 %v2263_v54  ;;  %v2454_v24 = vmul.f32 -1.442695, %v2263_v54 }
0x3ae4   :  { %3004 = vpow2.f32 %v2454_v24 }
0x3aec   :  { %v3003_v26 = vpop.eup %3002 }
0x3aed   :  { %2276 = vrot.lane.b32.xlu0 %v3003_v26, %s3013_s22 }
0x3aee   :  { %v3005_v56 = vpop.eup %3004 }
0x3aef   :  { %v2267_v29 = vadd.f32 1.0, %v3005_v56 }
0x3af1   :  { %3006 = vrcp.f32 %v2267_v29 }
0x3afb   :  { %v3007_v31 = vpop.eup %3006 }
0x3afc   :  { %v2274_v33 = vmul.f32 %v3007_v31, %v2272_v60 }
0x3b02   :  { %v2356_v48 = vpop.permute.xlu1 %2355 }
0x3b03   :  { %v2358_v53 = vmul.f32 %v2999_v55, %v2356_v48 }
0x3b05   :  { %2364 = vrot.lane.b32.xlu1 %v2358_v53, %s3013_s22 }
0x3b5f   :  { %v2277_v6 = vpop.permute.xlu0 %2276 }
0x3b60   :  { %v2279_v32 = vmul.f32 %v3007_v31, %v2277_v6 }
0x3b62   :  { %2281 = vrot.lane.b32.xlu0 %v2279_v32, %s3014_s23 }
0x3b77   :  { %v2365_v40 = vpop.permute.xlu1 %2364 }
0x3bd4   :  { %v2282_v34 = vpop.permute.xlu0 %2281 }
0x3bd5   :  { %v2284_v36 = vadd.f32 %v2282_v34, %v2274_v33 }
0x3bd7   :  { %3008 = vtanh.f32 %v2284_v36 }
0x3be1   :  { %v3009_v37 = vpop.eup %3008 }
0x3be2   :  { %2287 = vrot.lane.b32.xlu0 %v3009_v37, %s3013_s22 }
0x3c54   :  { %v2288_v38 = vpop.permute.xlu0 %2287 }
0x3c55   :  { %v2290_v39 = vmul.f32 %v3007_v31, %v2288_v38 }
0x3c57   :  { %2360 = vrot.lane.b32.xlu0 %v2290_v39, %s3014_s23 }
0x3cc9   :  { %v2361_v41 = vpop.permute.xlu0 %2360 }
0x3cca   :  { %v2367_v43 = vsel %vm181_vm2, %v2361_v41, %v2365_v40 }
0x3ccb   :  { %2369 = vst.msk [vmem:[%s3644_s7 - $0x4] sm:$0xf0] %vm2368_vm4, %v2367_v43 }

</bundles_post_ra>
